<compile_context>
chip_gen: v7x
topology: tpu7x:2x2x1
jax: 0.10.0
libtpu: 0.0.40
codegen_flags: <defaults>
</compile_context>

<pallas_src>
from functools import partial

import jax
import jax.numpy as jnp
from jax import lax
from jax.experimental import pallas as pl
from jax.experimental.pallas import tpu as pltpu


def _text_cl_kernel(z_ref, w_ref, b_ref, loss_ref, *, inv_temp, batch):
    """Fused MLP head (both views at once) + cosine-sim matrix + cross-entropy."""
    # ---- MLPLayer: single (2B,H) @ (H,H) matmul, bf16 operands, f32 accum.
    z = z_ref[...]                                                    # (2B, H) bf16
    w = w_ref[...]                                                    # (H, H) bf16
    b = b_ref[...]                                                    # (1, H) f32
    h = jnp.tanh(jnp.dot(z, w, preferred_element_type=jnp.float32) + b)   # (2B, H) f32

    # ---- contiguous, sublane-aligned split (views were de-interleaved in wrapper)
    h1 = h[:batch]                                                    # (B, H) f32
    h2 = h[batch:]                                                    # (B, H) f32

    # ---- per-row cosine scales: O(B) rsqrt on squared norms, 1/temp folded in.
    sq1 = jnp.sum(h1 * h1, axis=-1, keepdims=True)                    # (B, 1)
    sq2 = jnp.sum(h2 * h2, axis=-1, keepdims=True)                    # (B, 1)
    inv_n1 = lax.rsqrt(jnp.maximum(sq1, 1e-16)) * inv_temp            # (B, 1)
    inv_n2 = lax.rsqrt(jnp.maximum(sq2, 1e-16))                       # (B, 1)

    # ---- cross-view Gram on the MXU in bf16 (f32 accumulate), no h2 transpose.
    dots = lax.dot_general(
        h1.astype(jnp.bfloat16), h2.astype(jnp.bfloat16),
        dimension_numbers=(((1,), (1,)), ((), ())),
        preferred_element_type=jnp.float32)                           # (B, B)
    sim = dots * inv_n1 * inv_n2.T                                    # (B, B)

    # ---- positive-pair diagonal computed directly in f32 (no iota / select).
    diag = jnp.sum(h1 * h2, axis=-1, keepdims=True) * inv_n1 * inv_n2  # (B, 1)

    # ---- CrossEntropy(sim, arange(B)) == mean_i( logsumexp(sim_i) - sim_ii )
    m = jnp.max(sim, axis=-1, keepdims=True)
    lse = jnp.log(jnp.sum(jnp.exp(sim - m), axis=-1, keepdims=True)) + m   # (B, 1)
    loss = jnp.mean(lse - diag)

    loss_ref[...] = loss.reshape(1, 1)


def condenser_text_cl_forward(cls_hiddens, w, b, *, temp):
    """
    Forward of CondenserForPretraining with beit_args.only_text_cl == True.

    cls_hiddens: (2*B, H) -- [CLS] hidden states for the 2*B contrastive inputs
                 (rows 2i / 2i+1 are the two views of example i, matching
                 z.view(batch, 2, -1) in the reference).  bf16 preferred.
    w:           (H, H) dense weight (PyTorch nn.Linear.weight.T layout), bf16
                 preferred (store it persistently in bf16 to skip per-call casts).
    b:           (1, H) dense bias.
    Returns the same tuple as the PyTorch module: (cl_loss, 0.0, 0.0, cl_loss)
    """
    double_batch, hidden = cls_hiddens.shape
    assert double_batch % 2 == 0
    batch = double_batch // 2

    # De-interleave the two views OUTSIDE the kernel (one cheap XLA transpose):
    # rows 0..B-1 become view-1, rows B..2B-1 become view-2.
    z = cls_hiddens.reshape(batch, 2, hidden)
    z = jnp.swapaxes(z, 0, 1).reshape(double_batch, hidden)
    if z.dtype != jnp.bfloat16:
        z = z.astype(jnp.bfloat16)
    if w.dtype != jnp.bfloat16:
        w = w.astype(jnp.bfloat16)
    b2d = b.reshape(1, hidden).astype(jnp.float32)

    vmem = pl.BlockSpec(memory_space=pltpu.MemorySpace.VMEM)
    cl_loss = pl.pallas_call(
        partial(_text_cl_kernel, inv_temp=1.0 / temp, batch=batch),
        out_shape=jax.ShapeDtypeStruct((1, 1), jnp.float32),
        in_specs=[vmem, vmem, vmem],
        out_specs=vmem,
    )(z, w, b2d)[0, 0]

    zero = jnp.float32(0.0)
    return cl_loss, zero, zero, cl_loss


def _reference(cls_hiddens, w_bf16, b, temp):
    """Plain-JAX reference mirroring the PyTorch math (same bf16 dense inputs)."""
    db, h = cls_hiddens.shape
    zb = cls_hiddens.astype(jnp.bfloat16).astype(jnp.float32)
    wf = w_bf16.astype(jnp.float32)
    z = jnp.tanh(zb @ wf + b.reshape(1, h))
    z = z.reshape(db // 2, 2, h)
    z1, z2 = z[:, 0], z[:, 1]
    n1 = jnp.linalg.norm(z1, axis=-1, keepdims=True)
    n2 = jnp.linalg.norm(z2, axis=-1, keepdims=True)
    cos = (z1 @ z2.T) / jnp.maximum(n1 * n2.T, 1e-8)
    sim = cos / temp
    bsz = sim.shape[0]
    logp = sim - jax.scipy.special.logsumexp(sim, axis=-1, keepdims=True)
    return -jnp.mean(logp[jnp.arange(bsz), jnp.arange(bsz)])


if __name__ == "__main__":
    HIDDEN = 768        # MLPLayer(768) in the reference module
    BATCH = 8           # -> double_batch = 16 contrastive inputs (M = 16 rows)
    TEMP = 0.05         # beit_args.temp

    key = jax.random.PRNGKey(0)
    k_z, k_w, k_b = jax.random.split(key, 3)

    # synthetic [CLS] hidden states (stand-in for self.lm(...).hidden_states[-1][:, 0]),
    # produced once in bf16 as a real encoder would hand them over.
    cls_hiddens = jax.random.normal(
        k_z, (2 * BATCH, HIDDEN), dtype=jnp.float32).astype(jnp.bfloat16)

    # deterministic MLPLayer params (nn.Linear default init: U(-1/sqrt(H), 1/sqrt(H)));
    # weight stored persistently in bf16 (no per-call cast kernel).
    bound = 1.0 / (HIDDEN ** 0.5)
    w = jax.random.uniform(k_w, (HIDDEN, HIDDEN), jnp.float32, -bound, bound)  # = torch weight.T
    w_bf16 = w.astype(jnp.bfloat16)
    b = jax.random.uniform(k_b, (1, HIDDEN), jnp.float32, -bound, bound)

    out = condenser_text_cl_forward(cls_hiddens, w_bf16, b, temp=TEMP)
    out = jax.block_until_ready(out)
    cl_loss = out[0]

    ref = _reference(cls_hiddens.astype(jnp.float32), w_bf16, b, TEMP)
    assert jnp.isfinite(cl_loss)
    assert jnp.allclose(cl_loss, ref, rtol=1e-2, atol=1e-2), (cl_loss, ref)

    print("KERNEL_OK")
</pallas_src>

<mosaic_0001>
module attributes {stable_mosaic.version = 11 : i64} {
  func.func @_text_cl_kernel(%arg0: memref<16x768xbf16, #tpu.memory_space<vmem>>, %arg1: memref<768x768xbf16, #tpu.memory_space<vmem>>, %arg2: memref<1x768xf32, #tpu.memory_space<vmem>>, %arg3: memref<1x1xf32, #tpu.memory_space<vmem>>) attributes {dimension_semantics = [], scalar_prefetch = 0 : i64, scratch_operands = 0 : i64, tpu.core_type = #tpu.core_type<tc>} {
    %c0 = arith.constant 0 : index
    %c0_0 = arith.constant 0 : index
    %0 = vector.load %arg0[%c0, %c0_0] : memref<16x768xbf16, #tpu.memory_space<vmem>>, vector<16x768xbf16>
    %c0_1 = arith.constant 0 : index
    %c0_2 = arith.constant 0 : index
    %1 = vector.load %arg1[%c0_1, %c0_2] : memref<768x768xbf16, #tpu.memory_space<vmem>>, vector<768x768xbf16>
    %c0_3 = arith.constant 0 : index
    %c0_4 = arith.constant 0 : index
    %2 = vector.load %arg2[%c0_3, %c0_4] : memref<1x768xf32, #tpu.memory_space<vmem>>, vector<1x768xf32>
    %cst = arith.constant dense<0.000000e+00> : vector<16x768xf32>
    %3 = tpu.matmul %0, %1, %cst {dimension_numbers = #tpu.dot_dimension_numbers<[1], [0], [0], [1], [0, 0, 1, 1], [], []>} : vector<16x768xbf16>, vector<768x768xbf16>, vector<16x768xf32> -> vector<16x768xf32>
    %4 = vector.broadcast %2 : vector<1x768xf32> to vector<16x768xf32>
    %5 = arith.addf %3, %4 : vector<16x768xf32>
    %6 = math.tanh %5 : vector<16x768xf32>
    %7 = vector.extract_strided_slice %6 {offsets = [0, 0], sizes = [8, 768], strides = [1, 1]} : vector<16x768xf32> to vector<8x768xf32>
    %8 = vector.extract_strided_slice %6 {offsets = [8, 0], sizes = [8, 768], strides = [1, 1]} : vector<16x768xf32> to vector<8x768xf32>
    %9 = arith.mulf %7, %7 : vector<8x768xf32>
    %cst_5 = arith.constant dense<0.000000e+00> : vector<8xf32>
    %10 = vector.multi_reduction <add>, %9, %cst_5 [1] : vector<8x768xf32> to vector<8xf32>
    %11 = vector.shape_cast %10 : vector<8xf32> to vector<8x1xf32>
    %12 = arith.mulf %8, %8 : vector<8x768xf32>
    %cst_6 = arith.constant dense<0.000000e+00> : vector<8xf32>
    %13 = vector.multi_reduction <add>, %12, %cst_6 [1] : vector<8x768xf32> to vector<8xf32>
    %14 = vector.shape_cast %13 : vector<8xf32> to vector<8x1xf32>
    %cst_7 = arith.constant 1.000000e-16 : f32
    %15 = vector.broadcast %cst_7 : f32 to vector<8x1xf32>
    %16 = arith.maximumf %11, %15 : vector<8x1xf32>
    %17 = math.rsqrt %16 : vector<8x1xf32>
    %cst_8 = arith.constant 2.000000e+01 : f32
    %18 = vector.broadcast %cst_8 : f32 to vector<8x1xf32>
    %19 = arith.mulf %17, %18 : vector<8x1xf32>
    %cst_9 = arith.constant 1.000000e-16 : f32
    %20 = vector.broadcast %cst_9 : f32 to vector<8x1xf32>
    %21 = arith.maximumf %14, %20 : vector<8x1xf32>
    %22 = math.rsqrt %21 : vector<8x1xf32>
    %23 = arith.truncf %7 : vector<8x768xf32> to vector<8x768xbf16>
    %24 = arith.truncf %8 : vector<8x768xf32> to vector<8x768xbf16>
    %cst_10 = arith.constant dense<0.000000e+00> : vector<8x8xf32>
    %25 = tpu.matmul %23, %24, %cst_10 {dimension_numbers = #tpu.dot_dimension_numbers<[1], [1], [0], [0], [0, 0, 1, 0], [], []>} : vector<8x768xbf16>, vector<8x768xbf16>, vector<8x8xf32> -> vector<8x8xf32>
    %26 = vector.broadcast %19 : vector<8x1xf32> to vector<8x8xf32>
    %27 = arith.mulf %25, %26 : vector<8x8xf32>
    %28 = tpu.transpose %22, [1, 0] : vector<8x1xf32> -> vector<1x8xf32>
    %29 = vector.broadcast %28 : vector<1x8xf32> to vector<8x8xf32>
    %30 = arith.mulf %27, %29 : vector<8x8xf32>
    %31 = arith.mulf %7, %8 : vector<8x768xf32>
    %cst_11 = arith.constant dense<0.000000e+00> : vector<8xf32>
    %32 = vector.multi_reduction <add>, %31, %cst_11 [1] : vector<8x768xf32> to vector<8xf32>
    %33 = vector.shape_cast %32 : vector<8xf32> to vector<8x1xf32>
    %34 = arith.mulf %33, %19 : vector<8x1xf32>
    %35 = arith.mulf %34, %22 : vector<8x1xf32>
    %cst_12 = arith.constant dense<0xFF800000> : vector<8xf32>
    %36 = vector.multi_reduction <maximumf>, %30, %cst_12 [1] : vector<8x8xf32> to vector<8xf32>
    %37 = vector.shape_cast %36 : vector<8xf32> to vector<8x1xf32>
    %38 = vector.broadcast %37 : vector<8x1xf32> to vector<8x8xf32>
    %39 = arith.subf %30, %38 : vector<8x8xf32>
    %40 = math.exp %39 : vector<8x8xf32>
    %cst_13 = arith.constant dense<0.000000e+00> : vector<8xf32>
    %41 = vector.multi_reduction <add>, %40, %cst_13 [1] : vector<8x8xf32> to vector<8xf32>
    %42 = vector.shape_cast %41 : vector<8xf32> to vector<8x1xf32>
    %43 = math.log %42 : vector<8x1xf32>
    %44 = arith.addf %43, %37 : vector<8x1xf32>
    %45 = arith.subf %44, %35 : vector<8x1xf32>
    %46 = vector.shape_cast %45 : vector<8x1xf32> to vector<1x8x1xf32>
    %cst_14 = arith.constant dense<0.000000e+00> : vector<1xf32>
    %47 = vector.multi_reduction <add>, %46, %cst_14 [1, 2] : vector<1x8x1xf32> to vector<1xf32>
    %48 = vector.shape_cast %47 : vector<1xf32> to vector<1x1x1xf32>
    %49 = vector.extract %48[0, 0, 0] : f32 from vector<1x1x1xf32>
    %cst_15 = arith.constant 8.000000e+00 : f32
    %50 = arith.divf %49, %cst_15 : f32
    %51 = vector.broadcast %50 : f32 to vector<1x1xf32>
    %c0_16 = arith.constant 0 : index
    %c0_17 = arith.constant 0 : index
    %52 = vector.load %arg3[%c0_16, %c0_17] : memref<1x1xf32, #tpu.memory_space<vmem>>, vector<1x1xf32>
    tpu.vector_store %arg3[%c0_16, %c0_17], %51 {strides = array<i32>} : memref<1x1xf32, #tpu.memory_space<vmem>>, vector<1x1xf32>,
    return
  }
}

</mosaic_0001>

<bundles_post_ra>
// kernel: tpu_custom_call.1
= control target key start
LH: loop header
LB: loop body
LE: loop exit
PB: predicated region body
PF: predicated region fallthrough
CT: control target
= control target key end

     0   :  { %8 = vsyncpa [#allocation3], 0  ;;  %s3558_s0 = inlined_call_operand.hbm [shape: bf16[16,768], index: 0, kind: input, shape index: {}]   ;;  %s3559_s1 = inlined_call_operand.hbm [shape: bf16[768,768], index: 1, kind: input, shape index: {}]   ;;  %s3560_s2 = inlined_call_operand.hbm [shape: f32[1,768], index: 2, kind: input, shape index: {}]   ;;  %s3561_s3 = inlined_call_operand.hbm [shape: f32[1,1], index: 3, kind: output, shape index: {}]  }
   0x1   :  { %9 = vsyncpa [#allocation6], 0 }
   0x2   :  { %10 = vsyncpa [#allocation4], 0  ;;  %s3429_s12 = smov [#allocation5]   ;;  %s3430_s14 = smov [#allocation2]  }
   0x3   :  { %s28_s13 = sshll.u32 %s3429_s12, 4  ;;  %s16_s15 = sshll.u32 %s3430_s14, 4  ;;  %s29_s13 = int_to_ptr.vmem [resolvable:$true] %s28_s13  ;;  %s3455_s15 = int_to_ptr.vmem [resolvable:$true] %s16_s15 }
   0x4   :  { %s3335_s18 = scalar_lea.hbm %s3559_s1, 36864 }
   0x5   :  { %p3336_p0 = scmp.ne.s32.totalorder %s3559_s1, %s3335_s18  ;;  %p3339_p1 = scmp.lt.u32.totalorder %s3335_s18, %s3559_s1 }
   0x7   :  { %p3341_p2 = pnand %p3339_p1, %p3336_p0 }
   0x9   :  { %3344 = shalt.err (!%p3341_p2)
}
   0xa   :  { %s3345_s23 = scalar_lea.vmem %s29_s13, 36864  ;;  %p3350_p4 = scmp.lt.s32.totalorder %s29_s13, %s29_s13 }
   0xb   :  { %p3346_p3 = scmp.ne.s32.totalorder %s29_s13, %s3345_s23  ;;  %p3351_p5 = scmp.lt.s32.totalorder %s3345_s23, %s3345_s23 }
   0xd   :  { %p3352_p6 = por %p3351_p5, %p3350_p4 }
   0xf   :  { %p3353_p7 = pnand %p3352_p6, %p3346_p3 }
  0x11   :  { %3356 = shalt.err (!%p3353_p7)
}
  0x12   :  { %s3431_s24 = smov 384   ;;  %s3432_s25 = smov 24  }
  0x13   :  { %34 = dma.hbm_to_vmem [thread:$0]  %s3559_s1, 36864, %s29_s13, [#allocation6], %s3431_s24, %s3431_s24, %s3432_s25  }
  0x14   :  { %s3357_s30 = scalar_lea.hbm %s3558_s0, 768 }
  0x15   :  { %p3358_p8 = scmp.ne.s32.totalorder %s3558_s0, %s3357_s30  ;;  %p3361_p9 = scmp.lt.u32.totalorder %s3357_s30, %s3558_s0 }
  0x17   :  { %p3363_p10 = pnand %p3361_p9, %p3358_p8 }
  0x19   :  { %3366 = shalt.err (!%p3363_p10)
}
  0x1a   :  { %s3367_s8 = scalar_lea.vmem %s3455_s15, 768  ;;  %p3372_p12 = scmp.lt.s32.totalorder %s3455_s15, %s3455_s15 }
  0x1b   :  { %p3368_p11 = scmp.ne.s32.totalorder %s3455_s15, %s3367_s8  ;;  %p3373_p13 = scmp.lt.s32.totalorder %s3367_s8, %s3367_s8 }
  0x1d   :  { %p3374_p0 = por %p3373_p13, %p3372_p12 }
  0x1f   :  { %p3375_p1 = pnand %p3374_p0, %p3368_p11 }
  0x21   :  { %3378 = shalt.err (!%p3375_p1)
}
  0x22   :  { %22 = dma.hbm_to_vmem [thread:$0]  %s3558_s0, 768, %s3455_s15, [#allocation3], %s3431_s24, %s3431_s24, %s3432_s25  }
  0x23   :  { %s3433_s10 = smov [#allocation7]   ;;  %s3379_s14 = scalar_lea.hbm %s3560_s2, 96 }
  0x24   :  { %s41_s11 = sshll.u32 %s3433_s10, 4  ;;  %p3380_p2 = scmp.ne.s32.totalorder %s3560_s2, %s3379_s14  ;;  %s42_s11 = int_to_ptr.vmem [resolvable:$true] %s41_s11 }
  0x25   :  { %p3383_p3 = scmp.lt.u32.totalorder %s3379_s14, %s3560_s2 }
  0x27   :  { %p3385_p4 = pnand %p3383_p3, %p3380_p2 }
  0x29   :  { %3388 = shalt.err (!%p3385_p4)
}
  0x2a   :  { %s3389_s20 = scalar_lea.vmem %s42_s11, 96  ;;  %p3394_p6 = scmp.lt.s32.totalorder %s42_s11, %s42_s11 }
  0x2b   :  { %p3390_p5 = scmp.ne.s32.totalorder %s42_s11, %s3389_s20  ;;  %p3395_p7 = scmp.lt.s32.totalorder %s3389_s20, %s3389_s20 }
  0x2d   :  { %p3396_p8 = por %p3395_p7, %p3394_p6 }
  0x2f   :  { %p3397_p9 = pnand %p3396_p8, %p3390_p5 }
  0x31   :  { %3400 = shalt.err (!%p3397_p9)
}
  0x32   :  { %44 = dma.hbm_to_vmem [thread:$0]  %s3560_s2, 96, %s42_s11, [#allocation6]  }
  0x33   :  { %3423 = dma.done.wait [#allocation3], 768  }
  0x34   :  { %3424 = vsyncadd [#allocation3], 4294966528 }
  0x35   :  { %3425 = dma.done.wait [#allocation6], 36960  }
  0x36   :  { %3426 = vsyncadd [#allocation6], 4294930336  ;;  %v2860_v0 = vld [vmem:[#allocation5 + $0x4] ss:$24 sps:$4 sm:$0xff]   ;;  %v2864_v2 = vld [vmem:[#allocation5] ss:$24 sps:$4 sm:$0xff]  }
  0x37   :  { %v2862_v1 = vld [vmem:[#allocation5 + $0x304] ss:$24 sps:$4 sm:$0xff]   ;;  %1851 = vmatprep.subr.bf16.mxu1 %v2860_v0  ;;  %v2865_v3 = vld [vmem:[#allocation5 + $0x300] ss:$24 sps:$4 sm:$0xff]   ;;  %v2866_v4 = vld [vmem:[#allocation5 + $0x34] ss:$24 sps:$4 sm:$0xff]  }
  0x38   :  { %1894 = vmatprep.subr.bf16.mxu0 %v2862_v1  ;;  %1852 = vmatpush1.bf16.msra.mxu1 %v2864_v2  ;;  %v2868_v5 = vld [vmem:[#allocation5 + $0x334] ss:$24 sps:$4 sm:$0xff]   ;;  %v2870_v6 = vld [vmem:[#allocation5 + $0x30] ss:$24 sps:$4 sm:$0xff]   ;;  %v2872_v8 = vld [vmem:[#allocation5 + $0x64] ss:$24 sps:$4 sm:$0xff]  }
  0x39   :  { %1895 = vmatpush1.bf16.msra.mxu0 %v2865_v3  ;;  %1853 = vmatprep.subr.bf16.mxu1 %v2866_v4  ;;  %v2871_v7 = vld [vmem:[#allocation5 + $0x330] ss:$24 sps:$4 sm:$0xff]   ;;  %v2874_v9 = vld [vmem:[#allocation5 + $0x364] ss:$24 sps:$4 sm:$0xff]   ;;  %v2876_v10 = vld [vmem:[#allocation5 + $0x60] ss:$24 sps:$4 sm:$0xff]  }
  0x3a   :  { %1896 = vmatprep.subr.bf16.mxu0 %v2868_v5  ;;  %v2877_v11 = vld [vmem:[#allocation5 + $0x360] ss:$24 sps:$4 sm:$0xff]   ;;  %v2878_v12 = vld [vmem:[#allocation5 + $0x94] ss:$24 sps:$4 sm:$0xff]   ;;  %v2882_v14 = vld [vmem:[#allocation5 + $0x90] ss:$24 sps:$4 sm:$0xff]  }
  0x3b   :  { %v2880_v13 = vld [vmem:[#allocation5 + $0x394] ss:$24 sps:$4 sm:$0xff]   ;;  %v2883_v15 = vld [vmem:[#allocation5 + $0x390] ss:$24 sps:$4 sm:$0xff]   ;;  %v2884_v16 = vld [vmem:[#allocation5 + $0xc4] ss:$24 sps:$4 sm:$0xff]  }
  0x3c   :  { %1854 = vmatpush1.bf16.msra.mxu1 %v2870_v6  ;;  %v2886_v17 = vld [vmem:[#allocation5 + $0x3c4] ss:$24 sps:$4 sm:$0xff]   ;;  %v2888_v18 = vld [vmem:[#allocation5 + $0xc0] ss:$24 sps:$4 sm:$0xff]   ;;  %v2890_v20 = vld [vmem:[#allocation5 + $0xf4] ss:$24 sps:$4 sm:$0xff]  }
  0x3d   :  { %1897 = vmatpush1.bf16.msra.mxu0 %v2871_v7  ;;  %1855 = vmatprep.subr.bf16.mxu1 %v2872_v8  ;;  %v2889_v19 = vld [vmem:[#allocation5 + $0x3c0] ss:$24 sps:$4 sm:$0xff]   ;;  %v2892_v21 = vld [vmem:[#allocation5 + $0x3f4] ss:$24 sps:$4 sm:$0xff]   ;;  %v2894_v22 = vld [vmem:[#allocation5 + $0xf0] ss:$24 sps:$4 sm:$0xff]  }
  0x3e   :  { %1898 = vmatprep.subr.bf16.mxu0 %v2874_v9  ;;  %v2895_v23 = vld [vmem:[#allocation5 + $0x3f0] ss:$24 sps:$4 sm:$0xff]   ;;  %v2896_v24 = vld [vmem:[#allocation5 + $0x124] ss:$24 sps:$4 sm:$0xff]   ;;  %v2900_v26 = vld [vmem:[#allocation5 + $0x120] ss:$24 sps:$4 sm:$0xff]  }
  0x3f   :  { %v2898_v25 = vld [vmem:[#allocation5 + $0x424] ss:$24 sps:$4 sm:$0xff]   ;;  %v2901_v27 = vld [vmem:[#allocation5 + $0x420] ss:$24 sps:$4 sm:$0xff]   ;;  %v2902_v28 = vld [vmem:[#allocation5 + $0x154] ss:$24 sps:$4 sm:$0xff]  }
  0x40   :  { %1856 = vmatpush1.bf16.msra.mxu1 %v2876_v10  ;;  %v2904_v29 = vld [vmem:[#allocation5 + $0x454] ss:$24 sps:$4 sm:$0xff]   ;;  %v2906_v30 = vld [vmem:[#allocation5 + $0x150] ss:$24 sps:$4 sm:$0xff]   ;;  %v2908_v32 = vld [vmem:[#allocation5 + $0x184] ss:$24 sps:$4 sm:$0xff]  }
  0x41   :  { %1899 = vmatpush1.bf16.msra.mxu0 %v2877_v11  ;;  %1857 = vmatprep.subr.bf16.mxu1 %v2878_v12  ;;  %v2907_v31 = vld [vmem:[#allocation5 + $0x450] ss:$24 sps:$4 sm:$0xff]   ;;  %v2910_v33 = vld [vmem:[#allocation5 + $0x484] ss:$24 sps:$4 sm:$0xff]   ;;  %v2912_v34 = vld [vmem:[#allocation5 + $0x180] ss:$24 sps:$4 sm:$0xff]  }
  0x42   :  { %1900 = vmatprep.subr.bf16.mxu0 %v2880_v13  ;;  %v2913_v35 = vld [vmem:[#allocation5 + $0x480] ss:$24 sps:$4 sm:$0xff]   ;;  %v2914_v36 = vld [vmem:[#allocation5 + $0x1b4] ss:$24 sps:$4 sm:$0xff]   ;;  %v2918_v38 = vld [vmem:[#allocation5 + $0x1b0] ss:$24 sps:$4 sm:$0xff]  }
  0x43   :  { %v2916_v37 = vld [vmem:[#allocation5 + $0x4b4] ss:$24 sps:$4 sm:$0xff]   ;;  %v2919_v39 = vld [vmem:[#allocation5 + $0x4b0] ss:$24 sps:$4 sm:$0xff]   ;;  %v2920_v40 = vld [vmem:[#allocation5 + $0x1e4] ss:$24 sps:$4 sm:$0xff]  }
  0x44   :  { %1858 = vmatpush1.bf16.msra.mxu1 %v2882_v14  ;;  %v2922_v41 = vld [vmem:[#allocation5 + $0x4e4] ss:$24 sps:$4 sm:$0xff]   ;;  %v2924_v42 = vld [vmem:[#allocation5 + $0x1e0] ss:$24 sps:$4 sm:$0xff]   ;;  %v2926_v44 = vld [vmem:[#allocation5 + $0x214] ss:$24 sps:$4 sm:$0xff]  }
  0x45   :  { %1901 = vmatpush1.bf16.msra.mxu0 %v2883_v15  ;;  %1859 = vmatprep.subr.bf16.mxu1 %v2884_v16  ;;  %v2925_v43 = vld [vmem:[#allocation5 + $0x4e0] ss:$24 sps:$4 sm:$0xff]   ;;  %v2928_v45 = vld [vmem:[#allocation5 + $0x514] ss:$24 sps:$4 sm:$0xff]   ;;  %v2930_v46 = vld [vmem:[#allocation5 + $0x210] ss:$24 sps:$4 sm:$0xff]  }
  0x46   :  { %1902 = vmatprep.subr.bf16.mxu0 %v2886_v17  ;;  %v2931_v47 = vld [vmem:[#allocation5 + $0x510] ss:$24 sps:$4 sm:$0xff]   ;;  %v3498_v48 = vld [vmem:[#allocation2 + $0x4] ss:$24 sps:$4 sm:$0xff]   ;;  %v2932_v50 = vld [vmem:[#allocation5 + $0x244] ss:$24 sps:$4 sm:$0xff]  }
  0x47   :  { %v3500_v49 = vld [vmem:[#allocation2 + $0xc] ss:$24 sps:$4 sm:$0xff]   ;;  %1883 = vmatprep.mubr.bf16.mxu1 %v3498_v48  ;;  %v2936_v52 = vld [vmem:[#allocation5 + $0x240] ss:$24 sps:$4 sm:$0xff]   ;;  %v2942_v56 = vld [vmem:[#allocation5 + $0x270] ss:$24 sps:$4 sm:$0xff]  }
  0x48   :  { %1860 = vmatpush1.bf16.msra.mxu1 %v2888_v18  ;;  %v2934_v51 = vld [vmem:[#allocation5 + $0x544] ss:$24 sps:$4 sm:$0xff]   ;;  %1926 = vmatprep.mubr.bf16.mxu0 %v3500_v49  ;;  %v2937_v53 = vld [vmem:[#allocation5 + $0x540] ss:$24 sps:$4 sm:$0xff]   ;;  %v2938_v54 = vld [vmem:[#allocation5 + $0x274] ss:$24 sps:$4 sm:$0xff]  }
  0x49   :  { %1903 = vmatpush1.bf16.msra.mxu0 %v2889_v19  ;;  %1861 = vmatprep.subr.bf16.mxu1 %v2890_v20  ;;  %v2940_v55 = vld [vmem:[#allocation5 + $0x574] ss:$24 sps:$4 sm:$0xff]   ;;  %v2943_v57 = vld [vmem:[#allocation5 + $0x570] ss:$24 sps:$4 sm:$0xff]   ;;  %v2944_v58 = vld [vmem:[#allocation5 + $0x2a4] ss:$24 sps:$4 sm:$0xff]  }
  0x4a   :  { %1904 = vmatprep.subr.bf16.mxu0 %v2892_v21  ;;  %v2946_v59 = vld [vmem:[#allocation5 + $0x5a4] ss:$24 sps:$4 sm:$0xff]   ;;  %v2948_v60 = vld [vmem:[#allocation5 + $0x2a0] ss:$24 sps:$4 sm:$0xff]   ;;  %v2950_v62 = vld [vmem:[#allocation5 + $0x2d4] ss:$24 sps:$4 sm:$0xff]  }
  0x4b   :  { %v2949_v61 = vld [vmem:[#allocation5 + $0x5a0] ss:$24 sps:$4 sm:$0xff]   ;;  %v2952_v63 = vld [vmem:[#allocation5 + $0x5d4] ss:$24 sps:$4 sm:$0xff]   ;;  %v2954_v0 = vld [vmem:[#allocation5 + $0x2d0] ss:$24 sps:$4 sm:$0xff]  }
  0x4c   :  { %1862 = vmatpush1.bf16.msra.mxu1 %v2894_v22  ;;  %v2955_v1 = vld [vmem:[#allocation5 + $0x5d0] ss:$24 sps:$4 sm:$0xff]   ;;  %v2962_v2 = vld [vmem:[#allocation5 + $0x604] ss:$24 sps:$4 sm:$0xff]   ;;  %v2960_v4 = vld [vmem:[#allocation5 + $0x600] ss:$24 sps:$4 sm:$0xff]  }
  0x4d   :  { %1905 = vmatpush1.bf16.msra.mxu0 %v2895_v23  ;;  %1863 = vmatprep.subr.bf16.mxu1 %v2896_v24  ;;  %v2965_v3 = vld [vmem:[#allocation5 + $0xc] ss:$24 sps:$4 sm:$0xff]   ;;  %v2963_v5 = vld [vmem:[#allocation5 + $0x8] ss:$24 sps:$4 sm:$0xff]   ;;  %v3506_v7 = vld [vmem:[#allocation2 + $0x8] ss:$24 sps:$4 sm:$0xff]  }
  0x4e   :  { %1906 = vmatprep.subr.bf16.mxu0 %v2898_v25  ;;  %v3504_v6 = vld [vmem:[#allocation2] ss:$24 sps:$4 sm:$0xff]   ;;  %v2970_v8 = vld [vmem:[#allocation5 + $0x634] ss:$24 sps:$4 sm:$0xff]   ;;  %v2976_v12 = vld [vmem:[#allocation5 + $0x664] ss:$24 sps:$4 sm:$0xff]  }
  0x4f   :  { %v2973_v9 = vld [vmem:[#allocation5 + $0x3c] ss:$24 sps:$4 sm:$0xff]   ;;  %v2968_v10 = vld [vmem:[#allocation5 + $0x630] ss:$24 sps:$4 sm:$0xff]   ;;  %v2979_v13 = vld [vmem:[#allocation5 + $0x6c] ss:$24 sps:$4 sm:$0xff]  }
  0x50   :  { %1864 = vmatpush1.bf16.msra.mxu1 %v2900_v26  ;;  %v2971_v11 = vld [vmem:[#allocation5 + $0x38] ss:$24 sps:$4 sm:$0xff]   ;;  %v2977_v15 = vld [vmem:[#allocation5 + $0x68] ss:$24 sps:$4 sm:$0xff]   ;;  %v2982_v16 = vld [vmem:[#allocation5 + $0x694] ss:$24 sps:$4 sm:$0xff]  }
  0x51   :  { %1907 = vmatpush1.bf16.msra.mxu0 %v2901_v27  ;;  %1865 = vmatprep.subr.bf16.mxu1 %v2902_v28  ;;  %v2974_v14 = vld [vmem:[#allocation5 + $0x660] ss:$24 sps:$4 sm:$0xff]   ;;  %v2985_v17 = vld [vmem:[#allocation5 + $0x9c] ss:$24 sps:$4 sm:$0xff]   ;;  %v2980_v18 = vld [vmem:[#allocation5 + $0x690] ss:$24 sps:$4 sm:$0xff]  }
  0x52   :  { %1908 = vmatprep.subr.bf16.mxu0 %v2904_v29  ;;  %v2983_v19 = vld [vmem:[#allocation5 + $0x98] ss:$24 sps:$4 sm:$0xff]   ;;  %v2988_v20 = vld [vmem:[#allocation5 + $0x6c4] ss:$24 sps:$4 sm:$0xff]   ;;  %v2989_v23 = vld [vmem:[#allocation5 + $0xc8] ss:$24 sps:$4 sm:$0xff]  }
  0x53   :  { %v2991_v21 = vld [vmem:[#allocation5 + $0xcc] ss:$24 sps:$4 sm:$0xff]   ;;  %v2986_v22 = vld [vmem:[#allocation5 + $0x6c0] ss:$24 sps:$4 sm:$0xff]   ;;  %v2997_v25 = vld [vmem:[#allocation5 + $0xfc] ss:$24 sps:$4 sm:$0xff]  }
  0x54   :  { %1866 = vmatpush1.bf16.msra.mxu1 %v2906_v30  ;;  %v2994_v24 = vld [vmem:[#allocation5 + $0x6f4] ss:$24 sps:$4 sm:$0xff]   ;;  %v2992_v26 = vld [vmem:[#allocation5 + $0x6f0] ss:$24 sps:$4 sm:$0xff]   ;;  %v3000_v28 = vld [vmem:[#allocation5 + $0x724] ss:$24 sps:$4 sm:$0xff]  }
  0x55   :  { %1909 = vmatpush1.bf16.msra.mxu0 %v2907_v31  ;;  %1867 = vmatprep.subr.bf16.mxu1 %v2908_v32  ;;  %v2995_v27 = vld [vmem:[#allocation5 + $0xf8] ss:$24 sps:$4 sm:$0xff]   ;;  %v3003_v29 = vld [vmem:[#allocation5 + $0x12c] ss:$24 sps:$4 sm:$0xff]   ;;  %v3001_v31 = vld [vmem:[#allocation5 + $0x128] ss:$24 sps:$4 sm:$0xff]  }
  0x56   :  { %1910 = vmatprep.subr.bf16.mxu0 %v2910_v33  ;;  %v2998_v30 = vld [vmem:[#allocation5 + $0x720] ss:$24 sps:$4 sm:$0xff]   ;;  %v3006_v32 = vld [vmem:[#allocation5 + $0x754] ss:$24 sps:$4 sm:$0xff]   ;;  %vm2466_vm0 = vcmask 64512   ;;  %vm2480_vm1 = vcmask 7168  }
  0x57   :  { %v3009_v33 = vld [vmem:[#allocation5 + $0x15c] ss:$24 sps:$4 sm:$0xff]   ;;  %s3434_s2 = smov [#allocation8]   ;;  %vm2495_vm2 = vcmask 0  }
  0x58   :  { %1868 = vmatpush1.bf16.msra.mxu1 %v2912_v34  ;;  %v3511_v34 = vld [vmem:[#allocation2 + $0x14] ss:$24 sps:$4 sm:$0xff]   ;;  %s2503_s21 = sshll.u32 %s3434_s2, 4  ;;  %s2504_s21 = int_to_ptr.vmem [resolvable:$true] %s2503_s21 }
  0x59   :  { %1911 = vmatpush1.bf16.msra.mxu0 %v2913_v35  ;;  %1869 = vmatprep.subr.bf16.mxu1 %v2914_v36  ;;  %v3004_v35 = vld [vmem:[#allocation5 + $0x750] ss:$24 sps:$4 sm:$0xff]   ;;  %s3401_s24 = scalar_lea.vmem %s2504_s21, 16  ;;  %s3405_s25 = scalar_lea.vmem %s2504_s21, 32 }
  0x5a   :  { %1912 = vmatprep.subr.bf16.mxu0 %v2916_v37  ;;  %v3007_v36 = vld [vmem:[#allocation5 + $0x158] ss:$24 sps:$4 sm:$0xff]   ;;  %v3012_v37 = vld [vmem:[#allocation5 + $0x784] ss:$24 sps:$4 sm:$0xff]   ;;  %p3402_p10 = scmp.ne.s32.totalorder %s2504_s21, %s3401_s24  ;;  %p3406_p11 = scmp.lt.s32.totalorder %s2504_s21, %s2504_s21 }
  0x5b   :  { %p3407_p12 = scmp.lt.s32.totalorder %s3405_s25, %s3401_s24 }
  0x5c   :  { %1870 = vmatpush1.bf16.msra.mxu1 %v2918_v38  ;;  %v3015_v38 = vld [vmem:[#allocation5 + $0x18c] ss:$24 sps:$4 sm:$0xff]  }
  0x5d   :  { %1913 = vmatpush1.bf16.msra.mxu0 %v2919_v39  ;;  %1871 = vmatprep.subr.bf16.mxu1 %v2920_v40  ;;  %v3010_v39 = vld [vmem:[#allocation5 + $0x780] ss:$24 sps:$4 sm:$0xff]   ;;  %p3408_p13 = por %p3407_p12, %p3406_p11 }
  0x5e   :  { %1914 = vmatprep.subr.bf16.mxu0 %v2922_v41  ;;  %v3013_v40 = vld [vmem:[#allocation5 + $0x188] ss:$24 sps:$4 sm:$0xff]   ;;  %v3018_v41 = vld [vmem:[#allocation5 + $0x7b4] ss:$24 sps:$4 sm:$0xff]  }
  0x5f   :  { %p3409_p0 = pnand %p3408_p13, %p3402_p10 }
  0x60   :  { %1872 = vmatpush1.bf16.msra.mxu1 %v2924_v42  ;;  %v3021_v42 = vld [vmem:[#allocation5 + $0x1bc] ss:$24 sps:$4 sm:$0xff]  }
  0x61   :  { %1915 = vmatpush1.bf16.msra.mxu0 %v2925_v43  ;;  %1873 = vmatprep.subr.bf16.mxu1 %v2926_v44  ;;  %v3016_v43 = vld [vmem:[#allocation5 + $0x7b0] ss:$24 sps:$4 sm:$0xff]  }
  0x62   :  { %1916 = vmatprep.subr.bf16.mxu0 %v2928_v45  ;;  %v3019_v44 = vld [vmem:[#allocation5 + $0x1b8] ss:$24 sps:$4 sm:$0xff]   ;;  %v3024_v45 = vld [vmem:[#allocation5 + $0x7e4] ss:$24 sps:$4 sm:$0xff]  }
  0x64   :  { %1874 = vmatpush1.bf16.msra.mxu1 %v2930_v46  ;;  %v3027_v46 = vld [vmem:[#allocation5 + $0x1ec] ss:$24 sps:$4 sm:$0xff]  }
  0x65   :  { %1917 = vmatpush1.bf16.msra.mxu0 %v2931_v47  ;;  %1875 = vmatprep.subr.bf16.mxu1 %v2932_v50  ;;  %v3022_v47 = vld [vmem:[#allocation5 + $0x7e0] ss:$24 sps:$4 sm:$0xff]  }
  0x66   :  { %1918 = vmatprep.subr.bf16.mxu0 %v2934_v51  ;;  %v3025_v50 = vld [vmem:[#allocation5 + $0x1e8] ss:$24 sps:$4 sm:$0xff]   ;;  %v3030_v51 = vld [vmem:[#allocation5 + $0x814] ss:$24 sps:$4 sm:$0xff]  }
  0x68   :  { %1876 = vmatpush1.bf16.msra.mxu1 %v2936_v52  ;;  %v3033_v52 = vld [vmem:[#allocation5 + $0x21c] ss:$24 sps:$4 sm:$0xff]  }
  0x69   :  { %1919 = vmatpush1.bf16.msra.mxu0 %v2937_v53  ;;  %1877 = vmatprep.subr.bf16.mxu1 %v2938_v54  ;;  %v3028_v53 = vld [vmem:[#allocation5 + $0x810] ss:$24 sps:$4 sm:$0xff]  }
  0x6a   :  { %1920 = vmatprep.subr.bf16.mxu0 %v2940_v55  ;;  %v3031_v54 = vld [vmem:[#allocation5 + $0x218] ss:$24 sps:$4 sm:$0xff]   ;;  %v3036_v55 = vld [vmem:[#allocation5 + $0x844] ss:$24 sps:$4 sm:$0xff]  }
  0x6c   :  { %1878 = vmatpush1.bf16.msra.mxu1 %v2942_v56  ;;  %v3039_v56 = vld [vmem:[#allocation5 + $0x24c] ss:$24 sps:$4 sm:$0xff]  }
  0x6d   :  { %1921 = vmatpush1.bf16.msra.mxu0 %v2943_v57  ;;  %1879 = vmatprep.subr.bf16.mxu1 %v2944_v58  ;;  %v3034_v57 = vld [vmem:[#allocation5 + $0x840] ss:$24 sps:$4 sm:$0xff]  }
  0x6e   :  { %1922 = vmatprep.subr.bf16.mxu0 %v2946_v59  ;;  %v3037_v58 = vld [vmem:[#allocation5 + $0x248] ss:$24 sps:$4 sm:$0xff]   ;;  %v3042_v59 = vld [vmem:[#allocation5 + $0x874] ss:$24 sps:$4 sm:$0xff]  }
  0x70   :  { %1880 = vmatpush1.bf16.msra.mxu1 %v2948_v60  ;;  %v3045_v60 = vld [vmem:[#allocation5 + $0x27c] ss:$24 sps:$4 sm:$0xff]  }
  0x71   :  { %1923 = vmatpush1.bf16.msra.mxu0 %v2949_v61  ;;  %1881 = vmatprep.subr.bf16.mxu1 %v2950_v62  ;;  %v3040_v61 = vld [vmem:[#allocation5 + $0x870] ss:$24 sps:$4 sm:$0xff]  }
  0x72   :  { %1924 = vmatprep.subr.bf16.mxu0 %v2952_v63  ;;  %v3043_v62 = vld [vmem:[#allocation5 + $0x278] ss:$24 sps:$4 sm:$0xff]   ;;  %v3048_v63 = vld [vmem:[#allocation5 + $0x8a4] ss:$24 sps:$4 sm:$0xff]  }
  0x74   :  { %1882 = vmatpush1.bf16.msra.mxu1 %v2954_v0  ;;  %v3051_v0 = vld [vmem:[#allocation5 + $0x2ac] ss:$24 sps:$4 sm:$0xff]  }
  0x75   :  { %1925 = vmatpush1.bf16.msra.mxu0 %v2955_v1  ;;  %1980 = vmatprep.subr.bf16.mxu1 %v2965_v3  ;;  %v3046_v1 = vld [vmem:[#allocation5 + $0x8a0] ss:$24 sps:$4 sm:$0xff]   ;;  %v3054_v3 = vld [vmem:[#allocation5 + $0x8d4] ss:$24 sps:$4 sm:$0xff]  }
  0x76   :  { %1937 = vmatprep.subr.bf16.mxu0 %v2962_v2  ;;  %v3049_v2 = vld [vmem:[#allocation5 + $0x2a8] ss:$24 sps:$4 sm:$0xff]  }
  0x77   :  { %1884 = vmatmul.mubr.bf16.vlgmr.msra.gmra.mrb[0].mxu1 %v3504_v6 }
  0x78   :  { %1927 = vmatmul.mubr.bf16.vlgmr.msra.gmra.mrb[0].mxu0 %v3506_v7  ;;  %1981 = vmatpush1.bf16.msra.mxu1 %v2963_v5  ;;  %v3052_v5 = vld [vmem:[#allocation5 + $0x8d0] ss:$24 sps:$4 sm:$0xff]  }
  0x79   :  { %1938 = vmatpush1.bf16.msra.mxu0 %v2960_v4  ;;  %1982 = vmatprep.subr.bf16.mxu1 %v2973_v9  ;;  %v3057_v4 = vld [vmem:[#allocation5 + $0x2dc] ss:$24 sps:$4 sm:$0xff]   ;;  %v3063_v9 = vld [vmem:[#allocation5 + $0x30c] ss:$24 sps:$4 sm:$0xff]  }
  0x7a   :  { %1939 = vmatprep.subr.bf16.mxu0 %v2970_v8  ;;  %2012 = vmatprep.mubr.bf16.mxu1 %v3498_v48  ;;  %v3055_v8 = vld [vmem:[#allocation5 + $0x2d8] ss:$24 sps:$4 sm:$0xff]  }
  0x7b   :  { %1969 = vmatprep.mubr.bf16.mxu0 %v3511_v34 }
  0x7c   :  { %1983 = vmatpush1.bf16.msra.mxu1 %v2971_v11  ;;  %v3514_v11 = vld [vmem:[#allocation2 + $0x10] ss:$24 sps:$4 sm:$0xff]  }
  0x7d   :  { %1940 = vmatpush1.bf16.msra.mxu0 %v2968_v10  ;;  %1984 = vmatprep.subr.bf16.mxu1 %v2979_v13  ;;  %v3066_v10 = vld [vmem:[#allocation5 + $0x14] ss:$24 sps:$4 sm:$0xff]   ;;  %v3064_v13 = vld [vmem:[#allocation5 + $0x10] ss:$24 sps:$4 sm:$0xff]  }
  0x7e   :  { %1941 = vmatprep.subr.bf16.mxu0 %v2976_v12  ;;  %v3061_v12 = vld [vmem:[#allocation5 + $0x308] ss:$24 sps:$4 sm:$0xff]  }
  0x80   :  { %1985 = vmatpush1.bf16.msra.mxu1 %v2977_v15  ;;  %v3072_v15 = vld [vmem:[#allocation5 + $0x44] ss:$24 sps:$4 sm:$0xff]  }
  0x81   :  { %1942 = vmatpush1.bf16.msra.mxu0 %v2974_v14  ;;  %1986 = vmatprep.subr.bf16.mxu1 %v2985_v17  ;;  %v3069_v14 = vld [vmem:[#allocation5 + $0x33c] ss:$24 sps:$4 sm:$0xff]   ;;  %v3070_v17 = vld [vmem:[#allocation5 + $0x40] ss:$24 sps:$4 sm:$0xff]  }
  0x82   :  { %1943 = vmatprep.subr.bf16.mxu0 %v2982_v16  ;;  %v3067_v16 = vld [vmem:[#allocation5 + $0x338] ss:$24 sps:$4 sm:$0xff]  }
  0x84   :  { %1987 = vmatpush1.bf16.msra.mxu1 %v2983_v19  ;;  %v3078_v19 = vld [vmem:[#allocation5 + $0x74] ss:$24 sps:$4 sm:$0xff]  }
  0x85   :  { %1944 = vmatpush1.bf16.msra.mxu0 %v2980_v18  ;;  %1988 = vmatprep.subr.bf16.mxu1 %v2991_v21  ;;  %v3075_v18 = vld [vmem:[#allocation5 + $0x36c] ss:$24 sps:$4 sm:$0xff]   ;;  %v3076_v21 = vld [vmem:[#allocation5 + $0x70] ss:$24 sps:$4 sm:$0xff]  }
  0x86   :  { %1945 = vmatprep.subr.bf16.mxu0 %v2988_v20  ;;  %v3073_v20 = vld [vmem:[#allocation5 + $0x368] ss:$24 sps:$4 sm:$0xff]  }
  0x88   :  { %1989 = vmatpush1.bf16.msra.mxu1 %v2989_v23  ;;  %v3084_v23 = vld [vmem:[#allocation5 + $0xa4] ss:$24 sps:$4 sm:$0xff]  }
  0x89   :  { %1946 = vmatpush1.bf16.msra.mxu0 %v2986_v22  ;;  %1990 = vmatprep.subr.bf16.mxu1 %v2997_v25  ;;  %v3081_v22 = vld [vmem:[#allocation5 + $0x39c] ss:$24 sps:$4 sm:$0xff]   ;;  %v3082_v25 = vld [vmem:[#allocation5 + $0xa0] ss:$24 sps:$4 sm:$0xff]  }
  0x8a   :  { %1947 = vmatprep.subr.bf16.mxu0 %v2994_v24  ;;  %v3079_v24 = vld [vmem:[#allocation5 + $0x398] ss:$24 sps:$4 sm:$0xff]  }
  0x8c   :  { %1991 = vmatpush1.bf16.msra.mxu1 %v2995_v27  ;;  %v3090_v27 = vld [vmem:[#allocation5 + $0xd4] ss:$24 sps:$4 sm:$0xff]  }
  0x8d   :  { %1948 = vmatpush1.bf16.msra.mxu0 %v2992_v26  ;;  %1992 = vmatprep.subr.bf16.mxu1 %v3003_v29  ;;  %v3087_v26 = vld [vmem:[#allocation5 + $0x3cc] ss:$24 sps:$4 sm:$0xff]  }
  0x8e   :  { %1949 = vmatprep.subr.bf16.mxu0 %v3000_v28  ;;  %v3085_v28 = vld [vmem:[#allocation5 + $0x3c8] ss:$24 sps:$4 sm:$0xff]   ;;  %v3096_v29 = vld [vmem:[#allocation5 + $0x104] ss:$24 sps:$4 sm:$0xff]  }
  0x90   :  { %1993 = vmatpush1.bf16.msra.mxu1 %v3001_v31  ;;  %v3094_v31 = vld [vmem:[#allocation5 + $0x100] ss:$24 sps:$4 sm:$0xff]  }
  0x91   :  { %1950 = vmatpush1.bf16.msra.mxu0 %v2998_v30  ;;  %1994 = vmatprep.subr.bf16.mxu1 %v3009_v33  ;;  %v3091_v30 = vld [vmem:[#allocation5 + $0x3f8] ss:$24 sps:$4 sm:$0xff]   ;;  %v3102_v33 = vld [vmem:[#allocation5 + $0x134] ss:$24 sps:$4 sm:$0xff]  }
  0x92   :  { %1951 = vmatprep.subr.bf16.mxu0 %v3006_v32  ;;  %v3099_v32 = vld [vmem:[#allocation5 + $0x42c] ss:$24 sps:$4 sm:$0xff]  }
  0x94   :  { %1995 = vmatpush1.bf16.msra.mxu1 %v3007_v36  ;;  %v3100_v36 = vld [vmem:[#allocation5 + $0x130] ss:$24 sps:$4 sm:$0xff]  }
  0x95   :  { %1952 = vmatpush1.bf16.msra.mxu0 %v3004_v35  ;;  %1996 = vmatprep.subr.bf16.mxu1 %v3015_v38  ;;  %v3097_v35 = vld [vmem:[#allocation5 + $0x428] ss:$24 sps:$4 sm:$0xff]   ;;  %v3108_v38 = vld [vmem:[#allocation5 + $0x164] ss:$24 sps:$4 sm:$0xff]  }
  0x96   :  { %1953 = vmatprep.subr.bf16.mxu0 %v3012_v37  ;;  %v3105_v37 = vld [vmem:[#allocation5 + $0x45c] ss:$24 sps:$4 sm:$0xff]  }
  0x98   :  { %1997 = vmatpush1.bf16.msra.mxu1 %v3013_v40  ;;  %v3106_v40 = vld [vmem:[#allocation5 + $0x160] ss:$24 sps:$4 sm:$0xff]  }
  0x99   :  { %1954 = vmatpush1.bf16.msra.mxu0 %v3010_v39  ;;  %1998 = vmatprep.subr.bf16.mxu1 %v3021_v42  ;;  %v3103_v39 = vld [vmem:[#allocation5 + $0x458] ss:$24 sps:$4 sm:$0xff]   ;;  %v3114_v42 = vld [vmem:[#allocation5 + $0x194] ss:$24 sps:$4 sm:$0xff]  }
  0x9a   :  { %1955 = vmatprep.subr.bf16.mxu0 %v3018_v41  ;;  %v3111_v41 = vld [vmem:[#allocation5 + $0x48c] ss:$24 sps:$4 sm:$0xff]  }
  0x9c   :  { %1999 = vmatpush1.bf16.msra.mxu1 %v3019_v44  ;;  %v3112_v44 = vld [vmem:[#allocation5 + $0x190] ss:$24 sps:$4 sm:$0xff]  }
  0x9d   :  { %1956 = vmatpush1.bf16.msra.mxu0 %v3016_v43  ;;  %2000 = vmatprep.subr.bf16.mxu1 %v3027_v46  ;;  %v3109_v43 = vld [vmem:[#allocation5 + $0x488] ss:$24 sps:$4 sm:$0xff]   ;;  %v3120_v46 = vld [vmem:[#allocation5 + $0x1c4] ss:$24 sps:$4 sm:$0xff]  }
  0x9e   :  { %1957 = vmatprep.subr.bf16.mxu0 %v3024_v45  ;;  %v3117_v45 = vld [vmem:[#allocation5 + $0x4bc] ss:$24 sps:$4 sm:$0xff]  }
  0xa0   :  { %2001 = vmatpush1.bf16.msra.mxu1 %v3025_v50  ;;  %v3118_v50 = vld [vmem:[#allocation5 + $0x1c0] ss:$24 sps:$4 sm:$0xff]  }
  0xa1   :  { %1958 = vmatpush1.bf16.msra.mxu0 %v3022_v47  ;;  %2002 = vmatprep.subr.bf16.mxu1 %v3033_v52  ;;  %v3115_v47 = vld [vmem:[#allocation5 + $0x4b8] ss:$24 sps:$4 sm:$0xff]   ;;  %v3126_v52 = vld [vmem:[#allocation5 + $0x1f4] ss:$24 sps:$4 sm:$0xff]  }
  0xa2   :  { %1959 = vmatprep.subr.bf16.mxu0 %v3030_v51  ;;  %v3123_v51 = vld [vmem:[#allocation5 + $0x4ec] ss:$24 sps:$4 sm:$0xff]  }
  0xa4   :  { %2003 = vmatpush1.bf16.msra.mxu1 %v3031_v54  ;;  %v3124_v54 = vld [vmem:[#allocation5 + $0x1f0] ss:$24 sps:$4 sm:$0xff]  }
  0xa5   :  { %1960 = vmatpush1.bf16.msra.mxu0 %v3028_v53  ;;  %2004 = vmatprep.subr.bf16.mxu1 %v3039_v56  ;;  %v3121_v53 = vld [vmem:[#allocation5 + $0x4e8] ss:$24 sps:$4 sm:$0xff]   ;;  %v3132_v56 = vld [vmem:[#allocation5 + $0x224] ss:$24 sps:$4 sm:$0xff]  }
  0xa6   :  { %1961 = vmatprep.subr.bf16.mxu0 %v3036_v55  ;;  %v3129_v55 = vld [vmem:[#allocation5 + $0x51c] ss:$24 sps:$4 sm:$0xff]  }
  0xa8   :  { %2005 = vmatpush1.bf16.msra.mxu1 %v3037_v58  ;;  %v3130_v58 = vld [vmem:[#allocation5 + $0x220] ss:$24 sps:$4 sm:$0xff]  }
  0xa9   :  { %1962 = vmatpush1.bf16.msra.mxu0 %v3034_v57  ;;  %2006 = vmatprep.subr.bf16.mxu1 %v3045_v60  ;;  %v3127_v57 = vld [vmem:[#allocation5 + $0x518] ss:$24 sps:$4 sm:$0xff]   ;;  %v3138_v60 = vld [vmem:[#allocation5 + $0x254] ss:$24 sps:$4 sm:$0xff]  }
  0xaa   :  { %1963 = vmatprep.subr.bf16.mxu0 %v3042_v59  ;;  %v3135_v59 = vld [vmem:[#allocation5 + $0x54c] ss:$24 sps:$4 sm:$0xff]  }
  0xac   :  { %2007 = vmatpush1.bf16.msra.mxu1 %v3043_v62  ;;  %v3136_v62 = vld [vmem:[#allocation5 + $0x250] ss:$24 sps:$4 sm:$0xff]  }
  0xad   :  { %1964 = vmatpush1.bf16.msra.mxu0 %v3040_v61  ;;  %2008 = vmatprep.subr.bf16.mxu1 %v3051_v0  ;;  %v3133_v61 = vld [vmem:[#allocation5 + $0x548] ss:$24 sps:$4 sm:$0xff]   ;;  %v3144_v0 = vld [vmem:[#allocation5 + $0x284] ss:$24 sps:$4 sm:$0xff]  }
  0xae   :  { %1965 = vmatprep.subr.bf16.mxu0 %v3048_v63  ;;  %v3141_v63 = vld [vmem:[#allocation5 + $0x57c] ss:$24 sps:$4 sm:$0xff]  }
  0xb0   :  { %2009 = vmatpush1.bf16.msra.mxu1 %v3049_v2  ;;  %v3142_v2 = vld [vmem:[#allocation5 + $0x280] ss:$24 sps:$4 sm:$0xff]  }
  0xb1   :  { %1966 = vmatpush1.bf16.msra.mxu0 %v3046_v1  ;;  %2010 = vmatprep.subr.bf16.mxu1 %v3057_v4  ;;  %v3139_v1 = vld [vmem:[#allocation5 + $0x578] ss:$24 sps:$4 sm:$0xff]   ;;  %v3150_v4 = vld [vmem:[#allocation5 + $0x2b4] ss:$24 sps:$4 sm:$0xff]  }
  0xb2   :  { %1967 = vmatprep.subr.bf16.mxu0 %v3054_v3  ;;  %v3147_v3 = vld [vmem:[#allocation5 + $0x5ac] ss:$24 sps:$4 sm:$0xff]  }
  0xb4   :  { %2011 = vmatpush1.bf16.msra.mxu1 %v3055_v8  ;;  %v3148_v8 = vld [vmem:[#allocation5 + $0x2b0] ss:$24 sps:$4 sm:$0xff]  }
  0xb5   :  { %1968 = vmatpush1.bf16.msra.mxu0 %v3052_v5  ;;  %2023 = vmatprep.subr.bf16.mxu1 %v3063_v9  ;;  %v3145_v5 = vld [vmem:[#allocation5 + $0x5a8] ss:$24 sps:$4 sm:$0xff]   ;;  %v3153_v9 = vld [vmem:[#allocation5 + $0x5dc] ss:$24 sps:$4 sm:$0xff]  }
  0xb6   :  { %2109 = vmatprep.subr.bf16.mxu0 %v3066_v10  ;;  %v3156_v10 = vld [vmem:[#allocation5 + $0x2e4] ss:$24 sps:$4 sm:$0xff]  }
  0xb7   :  { %2013 = vmatmul.mubr.bf16.vlgmr.msra.gmra.mrb[4].mxu1 %v3504_v6 }
  0xb8   :  { %1970 = vmatmul.mubr.bf16.vlgmr.msra.gmra.mrb[0].mxu0 %v3514_v11  ;;  %2024 = vmatpush1.bf16.msra.mxu1 %v3061_v12  ;;  %v3151_v12 = vld [vmem:[#allocation5 + $0x5d8] ss:$24 sps:$4 sm:$0xff]  }
  0xb9   :  { %2110 = vmatpush1.bf16.msra.mxu0 %v3064_v13  ;;  %2025 = vmatprep.subr.bf16.mxu1 %v3069_v14  ;;  %v3154_v13 = vld [vmem:[#allocation5 + $0x2e0] ss:$24 sps:$4 sm:$0xff]   ;;  %v3159_v14 = vld [vmem:[#allocation5 + $0x60c] ss:$24 sps:$4 sm:$0xff]  }
  0xba   :  { %2111 = vmatprep.subr.bf16.mxu0 %v3072_v15  ;;  %2055 = vmatprep.mubr.bf16.mxu1 %v3500_v49  ;;  %v3088_v49 = vld [vmem:[#allocation5 + $0xd0] ss:$24 sps:$4 sm:$0xff]   ;;  %v3162_v15 = vld [vmem:[#allocation5 + $0x314] ss:$24 sps:$4 sm:$0xff]  }
  0xbb   :  { %2141 = vmatprep.mubr.bf16.mxu0 %v3498_v48  ;;  %v3093_v48 = vld [vmem:[#allocation5 + $0x3fc] ss:$24 sps:$4 sm:$0xff]  }
  0xbc   :  { %2026 = vmatpush1.bf16.msra.mxu1 %v3067_v16  ;;  %v3157_v16 = vld [vmem:[#allocation5 + $0x608] ss:$24 sps:$4 sm:$0xff]  }
  0xbd   :  { %2112 = vmatpush1.bf16.msra.mxu0 %v3070_v17  ;;  %2027 = vmatprep.subr.bf16.mxu1 %v3075_v18  ;;  %v3160_v17 = vld [vmem:[#allocation5 + $0x310] ss:$24 sps:$4 sm:$0xff]   ;;  %v3165_v18 = vld [vmem:[#allocation5 + $0x63c] ss:$24 sps:$4 sm:$0xff]  }
  0xbe   :  { %2113 = vmatprep.subr.bf16.mxu0 %v3078_v19  ;;  %v3168_v19 = vld [vmem:[#allocation5 + $0x344] ss:$24 sps:$4 sm:$0xff]  }
  0xc0   :  { %2028 = vmatpush1.bf16.msra.mxu1 %v3073_v20  ;;  %v3163_v20 = vld [vmem:[#allocation5 + $0x638] ss:$24 sps:$4 sm:$0xff]  }
  0xc1   :  { %2114 = vmatpush1.bf16.msra.mxu0 %v3076_v21  ;;  %2029 = vmatprep.subr.bf16.mxu1 %v3081_v22  ;;  %v3166_v21 = vld [vmem:[#allocation5 + $0x340] ss:$24 sps:$4 sm:$0xff]   ;;  %v3171_v22 = vld [vmem:[#allocation5 + $0x66c] ss:$24 sps:$4 sm:$0xff]  }
  0xc2   :  { %2115 = vmatprep.subr.bf16.mxu0 %v3084_v23  ;;  %v3174_v23 = vld [vmem:[#allocation5 + $0x374] ss:$24 sps:$4 sm:$0xff]  }
  0xc4   :  { %2030 = vmatpush1.bf16.msra.mxu1 %v3079_v24  ;;  %v3333_v24 = vld [vmem:[#allocation2 + $0xc] ss:$24 sps:$4 sm:$0xff]  }
  0xc5   :  { %2116 = vmatpush1.bf16.msra.mxu0 %v3082_v25  ;;  %2031 = vmatprep.subr.bf16.mxu1 %v3087_v26  ;;  %v3169_v25 = vld [vmem:[#allocation5 + $0x668] ss:$24 sps:$4 sm:$0xff]  }
  0xc6   :  { %2117 = vmatprep.subr.bf16.mxu0 %v3090_v27  ;;  %v3172_v26 = vld [vmem:[#allocation5 + $0x370] ss:$24 sps:$4 sm:$0xff]  }
  0xc7   :  { %v3175_v27 = vld [vmem:[#allocation5 + $0x698] ss:$24 sps:$4 sm:$0xff]  }
  0xc8   :  { %2032 = vmatpush1.bf16.msra.mxu1 %v3085_v28  ;;  %v3178_v28 = vld [vmem:[#allocation5 + $0x3a0] ss:$24 sps:$4 sm:$0xff]  }
  0xc9   :  { %2118 = vmatpush1.bf16.msra.mxu0 %v3088_v49  ;;  %2033 = vmatprep.subr.bf16.mxu1 %v3093_v48  ;;  %v3183_v49 = vld [vmem:[#allocation5 + $0x6cc] ss:$24 sps:$4 sm:$0xff]  }
  0xca   :  { %2119 = vmatprep.subr.bf16.mxu0 %v3096_v29  ;;  %v3186_v48 = vld [vmem:[#allocation5 + $0x3d4] ss:$24 sps:$4 sm:$0xff]   ;;  %v3181_v29 = vld [vmem:[#allocation5 + $0x6c8] ss:$24 sps:$4 sm:$0xff]  }
  0xcc   :  { %2034 = vmatpush1.bf16.msra.mxu1 %v3091_v30  ;;  %v3184_v30 = vld [vmem:[#allocation5 + $0x3d0] ss:$24 sps:$4 sm:$0xff]  }
  0xcd   :  { %2120 = vmatpush1.bf16.msra.mxu0 %v3094_v31  ;;  %2035 = vmatprep.subr.bf16.mxu1 %v3099_v32  ;;  %v3189_v31 = vld [vmem:[#allocation5 + $0x6fc] ss:$24 sps:$4 sm:$0xff]  }
  0xce   :  { %2121 = vmatprep.subr.bf16.mxu0 %v3102_v33  ;;  %v3192_v32 = vld [vmem:[#allocation5 + $0x404] ss:$24 sps:$4 sm:$0xff]   ;;  %v3187_v33 = vld [vmem:[#allocation5 + $0x6f8] ss:$24 sps:$4 sm:$0xff]  }
  0xd0   :  { %2036 = vmatpush1.bf16.msra.mxu1 %v3097_v35  ;;  %v3190_v35 = vld [vmem:[#allocation5 + $0x400] ss:$24 sps:$4 sm:$0xff]  }
  0xd1   :  { %2122 = vmatpush1.bf16.msra.mxu0 %v3100_v36  ;;  %2037 = vmatprep.subr.bf16.mxu1 %v3105_v37  ;;  %v3195_v36 = vld [vmem:[#allocation5 + $0x72c] ss:$24 sps:$4 sm:$0xff]  }
  0xd2   :  { %2123 = vmatprep.subr.bf16.mxu0 %v3108_v38  ;;  %v3198_v37 = vld [vmem:[#allocation5 + $0x434] ss:$24 sps:$4 sm:$0xff]   ;;  %v3193_v38 = vld [vmem:[#allocation5 + $0x728] ss:$24 sps:$4 sm:$0xff]  }
  0xd4   :  { %2038 = vmatpush1.bf16.msra.mxu1 %v3103_v39  ;;  %v3196_v39 = vld [vmem:[#allocation5 + $0x430] ss:$24 sps:$4 sm:$0xff]  }
  0xd5   :  { %2124 = vmatpush1.bf16.msra.mxu0 %v3106_v40  ;;  %2039 = vmatprep.subr.bf16.mxu1 %v3111_v41  ;;  %v3201_v40 = vld [vmem:[#allocation5 + $0x75c] ss:$24 sps:$4 sm:$0xff]  }
  0xd6   :  { %2125 = vmatprep.subr.bf16.mxu0 %v3114_v42  ;;  %v3204_v41 = vld [vmem:[#allocation5 + $0x464] ss:$24 sps:$4 sm:$0xff]   ;;  %v3199_v42 = vld [vmem:[#allocation5 + $0x758] ss:$24 sps:$4 sm:$0xff]  }
  0xd8   :  { %2040 = vmatpush1.bf16.msra.mxu1 %v3109_v43  ;;  %v3202_v43 = vld [vmem:[#allocation5 + $0x460] ss:$24 sps:$4 sm:$0xff]  }
  0xd9   :  { %2126 = vmatpush1.bf16.msra.mxu0 %v3112_v44  ;;  %2041 = vmatprep.subr.bf16.mxu1 %v3117_v45  ;;  %v3207_v44 = vld [vmem:[#allocation5 + $0x78c] ss:$24 sps:$4 sm:$0xff]  }
  0xda   :  { %2127 = vmatprep.subr.bf16.mxu0 %v3120_v46  ;;  %v3210_v45 = vld [vmem:[#allocation5 + $0x494] ss:$24 sps:$4 sm:$0xff]   ;;  %v3205_v46 = vld [vmem:[#allocation5 + $0x788] ss:$24 sps:$4 sm:$0xff]  }
  0xdc   :  { %2042 = vmatpush1.bf16.msra.mxu1 %v3115_v47  ;;  %v3208_v47 = vld [vmem:[#allocation5 + $0x490] ss:$24 sps:$4 sm:$0xff]  }
  0xdd   :  { %2128 = vmatpush1.bf16.msra.mxu0 %v3118_v50  ;;  %2043 = vmatprep.subr.bf16.mxu1 %v3123_v51  ;;  %v3213_v50 = vld [vmem:[#allocation5 + $0x7bc] ss:$24 sps:$4 sm:$0xff]  }
  0xde   :  { %2129 = vmatprep.subr.bf16.mxu0 %v3126_v52  ;;  %v3216_v51 = vld [vmem:[#allocation5 + $0x4c4] ss:$24 sps:$4 sm:$0xff]   ;;  %v3211_v52 = vld [vmem:[#allocation5 + $0x7b8] ss:$24 sps:$4 sm:$0xff]  }
  0xe0   :  { %2044 = vmatpush1.bf16.msra.mxu1 %v3121_v53  ;;  %v3214_v53 = vld [vmem:[#allocation5 + $0x4c0] ss:$24 sps:$4 sm:$0xff]  }
  0xe1   :  { %2130 = vmatpush1.bf16.msra.mxu0 %v3124_v54  ;;  %2045 = vmatprep.subr.bf16.mxu1 %v3129_v55  ;;  %v3219_v54 = vld [vmem:[#allocation5 + $0x7ec] ss:$24 sps:$4 sm:$0xff]  }
  0xe2   :  { %2131 = vmatprep.subr.bf16.mxu0 %v3132_v56  ;;  %v3222_v55 = vld [vmem:[#allocation5 + $0x4f4] ss:$24 sps:$4 sm:$0xff]   ;;  %v3217_v56 = vld [vmem:[#allocation5 + $0x7e8] ss:$24 sps:$4 sm:$0xff]  }
  0xe4   :  { %2046 = vmatpush1.bf16.msra.mxu1 %v3127_v57  ;;  %v3220_v57 = vld [vmem:[#allocation5 + $0x4f0] ss:$24 sps:$4 sm:$0xff]  }
  0xe5   :  { %2132 = vmatpush1.bf16.msra.mxu0 %v3130_v58  ;;  %2047 = vmatprep.subr.bf16.mxu1 %v3135_v59  ;;  %v3225_v58 = vld [vmem:[#allocation5 + $0x81c] ss:$24 sps:$4 sm:$0xff]  }
  0xe6   :  { %2133 = vmatprep.subr.bf16.mxu0 %v3138_v60  ;;  %v3228_v59 = vld [vmem:[#allocation5 + $0x524] ss:$24 sps:$4 sm:$0xff]   ;;  %v3223_v60 = vld [vmem:[#allocation5 + $0x818] ss:$24 sps:$4 sm:$0xff]  }
  0xe8   :  { %2048 = vmatpush1.bf16.msra.mxu1 %v3133_v61  ;;  %v3226_v61 = vld [vmem:[#allocation5 + $0x520] ss:$24 sps:$4 sm:$0xff]  }
  0xe9   :  { %2134 = vmatpush1.bf16.msra.mxu0 %v3136_v62  ;;  %2049 = vmatprep.subr.bf16.mxu1 %v3141_v63  ;;  %v3231_v62 = vld [vmem:[#allocation5 + $0x84c] ss:$24 sps:$4 sm:$0xff]  }
  0xea   :  { %2135 = vmatprep.subr.bf16.mxu0 %v3144_v0  ;;  %v3234_v63 = vld [vmem:[#allocation5 + $0x554] ss:$24 sps:$4 sm:$0xff]   ;;  %v3229_v0 = vld [vmem:[#allocation5 + $0x848] ss:$24 sps:$4 sm:$0xff]  }
  0xec   :  { %2050 = vmatpush1.bf16.msra.mxu1 %v3139_v1  ;;  %v3232_v1 = vld [vmem:[#allocation5 + $0x550] ss:$24 sps:$4 sm:$0xff]  }
  0xed   :  { %2136 = vmatpush1.bf16.msra.mxu0 %v3142_v2  ;;  %2051 = vmatprep.subr.bf16.mxu1 %v3147_v3  ;;  %v3237_v2 = vld [vmem:[#allocation5 + $0x87c] ss:$24 sps:$4 sm:$0xff]  }
  0xee   :  { %2137 = vmatprep.subr.bf16.mxu0 %v3150_v4  ;;  %v3240_v3 = vld [vmem:[#allocation5 + $0x584] ss:$24 sps:$4 sm:$0xff]   ;;  %v3235_v4 = vld [vmem:[#allocation5 + $0x878] ss:$24 sps:$4 sm:$0xff]  }
  0xf0   :  { %2052 = vmatpush1.bf16.msra.mxu1 %v3145_v5  ;;  %v3238_v5 = vld [vmem:[#allocation5 + $0x580] ss:$24 sps:$4 sm:$0xff]  }
  0xf1   :  { %2138 = vmatpush1.bf16.msra.mxu0 %v3148_v8  ;;  %2053 = vmatprep.subr.bf16.mxu1 %v3153_v9  ;;  %v3243_v8 = vld [vmem:[#allocation5 + $0x8ac] ss:$24 sps:$4 sm:$0xff]  }
  0xf2   :  { %2139 = vmatprep.subr.bf16.mxu0 %v3156_v10  ;;  %v3246_v9 = vld [vmem:[#allocation5 + $0x5b4] ss:$24 sps:$4 sm:$0xff]   ;;  %v3241_v10 = vld [vmem:[#allocation5 + $0x8a8] ss:$24 sps:$4 sm:$0xff]  }
  0xf4   :  { %2054 = vmatpush1.bf16.msra.mxu1 %v3151_v12  ;;  %v3244_v12 = vld [vmem:[#allocation5 + $0x5b0] ss:$24 sps:$4 sm:$0xff]  }
  0xf5   :  { %2140 = vmatpush1.bf16.msra.mxu0 %v3154_v13  ;;  %2066 = vmatprep.subr.bf16.mxu1 %v3159_v14  ;;  %v3249_v13 = vld [vmem:[#allocation5 + $0x8dc] ss:$24 sps:$4 sm:$0xff]  }
  0xf6   :  { %2152 = vmatprep.subr.bf16.mxu0 %v3162_v15  ;;  %v3252_v14 = vld [vmem:[#allocation5 + $0x5e4] ss:$24 sps:$4 sm:$0xff]   ;;  %v3247_v15 = vld [vmem:[#allocation5 + $0x8d8] ss:$24 sps:$4 sm:$0xff]  }
  0xf7   :  { %2056 = vmatmul.mubr.bf16.vlgmr.msra.gmra.mrb[4].mxu1 %v3506_v7  ;;  %v3177_v7 = vld [vmem:[#allocation5 + $0x69c] ss:$24 sps:$4 sm:$0xff]  }
  0xf8   :  { %2142 = vmatmul.mubr.bf16.vlgmr.msra.gmra.mrb[4].mxu0 %v3504_v6  ;;  %2067 = vmatpush1.bf16.msra.mxu1 %v3157_v16  ;;  %v3180_v6 = vld [vmem:[#allocation5 + $0x3a4] ss:$24 sps:$4 sm:$0xff]   ;;  %v3250_v16 = vld [vmem:[#allocation5 + $0x5e0] ss:$24 sps:$4 sm:$0xff]  }
  0xf9   :  { %2153 = vmatpush1.bf16.msra.mxu0 %v3160_v17  ;;  %2068 = vmatprep.subr.bf16.mxu1 %v3165_v18  ;;  %v3255_v17 = vld [vmem:[#allocation5 + $0x614] ss:$24 sps:$4 sm:$0xff]   ;;  %v3253_v18 = vld [vmem:[#allocation5 + $0x610] ss:$24 sps:$4 sm:$0xff]  }
  0xfa   :  { %2154 = vmatprep.subr.bf16.mxu0 %v3168_v19  ;;  %2098 = vmatprep.mubr.bf16.mxu1 %v3511_v34  ;;  %v3258_v19 = vld [vmem:[#allocation5 + $0x644] ss:$24 sps:$4 sm:$0xff]  }
  0xfb   :  { %2184 = vmatprep.mubr.bf16.mxu0 %v3333_v24  ;;  %v3264_v24 = vld [vmem:[#allocation5 + $0x6a4] ss:$24 sps:$4 sm:$0xff]  }
  0xfc   :  { %2069 = vmatpush1.bf16.msra.mxu1 %v3163_v20  ;;  %v3334_v20 = vld [vmem:[#allocation2 + $0x8] ss:$24 sps:$4 sm:$0xff]  }
  0xfd   :  { %2155 = vmatpush1.bf16.msra.mxu0 %v3166_v21  ;;  %2070 = vmatprep.subr.bf16.mxu1 %v3171_v22  ;;  %v3256_v21 = vld [vmem:[#allocation5 + $0x640] ss:$24 sps:$4 sm:$0xff]   ;;  %v3261_v22 = vld [vmem:[#allocation5 + $0x674] ss:$24 sps:$4 sm:$0xff]  }
  0xfe   :  { %2156 = vmatprep.subr.bf16.mxu0 %v3174_v23  ;;  %v3259_v23 = vld [vmem:[#allocation5 + $0x670] ss:$24 sps:$4 sm:$0xff]  }
 0x100   :  { %2071 = vmatpush1.bf16.msra.mxu1 %v3169_v25  ;;  %v3262_v25 = vld [vmem:[#allocation5 + $0x6a0] ss:$24 sps:$4 sm:$0xff]  }
 0x101   :  { %2157 = vmatpush1.bf16.msra.mxu0 %v3172_v26  ;;  %2072 = vmatprep.subr.bf16.mxu1 %v3177_v7  ;;  %v3267_v26 = vld [vmem:[#allocation5 + $0x6d4] ss:$24 sps:$4 sm:$0xff]   ;;  %v3265_v7 = vld [vmem:[#allocation5 + $0x6d0] ss:$24 sps:$4 sm:$0xff]  }
 0x102   :  { %2158 = vmatprep.subr.bf16.mxu0 %v3180_v6  ;;  %v3270_v6 = vld [vmem:[#allocation5 + $0x704] ss:$24 sps:$4 sm:$0xff]  }
 0x104   :  { %2073 = vmatpush1.bf16.msra.mxu1 %v3175_v27  ;;  %v3268_v27 = vld [vmem:[#allocation5 + $0x700] ss:$24 sps:$4 sm:$0xff]  }
 0x105   :  { %2159 = vmatpush1.bf16.msra.mxu0 %v3178_v28  ;;  %2074 = vmatprep.subr.bf16.mxu1 %v3183_v49  ;;  %v3273_v28 = vld [vmem:[#allocation5 + $0x734] ss:$24 sps:$4 sm:$0xff]  }
 0x106   :  { %2160 = vmatprep.subr.bf16.mxu0 %v3186_v48  ;;  %v3271_v48 = vld [vmem:[#allocation5 + $0x730] ss:$24 sps:$4 sm:$0xff]  }
 0x108   :  { %2075 = vmatpush1.bf16.msra.mxu1 %v3181_v29 }
 0x109   :  { %2161 = vmatpush1.bf16.msra.mxu0 %v3184_v30  ;;  %2076 = vmatprep.subr.bf16.mxu1 %v3189_v31  ;;  %v3276_v30 = vld [vmem:[#allocation5 + $0x764] ss:$24 sps:$4 sm:$0xff]  }
 0x10a   :  { %2162 = vmatprep.subr.bf16.mxu0 %v3192_v32  ;;  %v3274_v32 = vld [vmem:[#allocation5 + $0x760] ss:$24 sps:$4 sm:$0xff]  }
 0x10c   :  { %2077 = vmatpush1.bf16.msra.mxu1 %v3187_v33  ;;  %v3279_v33 = vld [vmem:[#allocation5 + $0x794] ss:$24 sps:$4 sm:$0xff]  }
 0x10d   :  { %2163 = vmatpush1.bf16.msra.mxu0 %v3190_v35  ;;  %2078 = vmatprep.subr.bf16.mxu1 %v3195_v36  ;;  %v3277_v35 = vld [vmem:[#allocation5 + $0x790] ss:$24 sps:$4 sm:$0xff]   ;;  %v3282_v36 = vld [vmem:[#allocation5 + $0x7c4] ss:$24 sps:$4 sm:$0xff]  }
 0x10e   :  { %2164 = vmatprep.subr.bf16.mxu0 %v3198_v37  ;;  %v3280_v37 = vld [vmem:[#allocation5 + $0x7c0] ss:$24 sps:$4 sm:$0xff]  }
 0x110   :  { %2079 = vmatpush1.bf16.msra.mxu1 %v3193_v38  ;;  %v3285_v38 = vld [vmem:[#allocation5 + $0x7f4] ss:$24 sps:$4 sm:$0xff]  }
 0x111   :  { %2165 = vmatpush1.bf16.msra.mxu0 %v3196_v39  ;;  %2080 = vmatprep.subr.bf16.mxu1 %v3201_v40  ;;  %v3283_v39 = vld [vmem:[#allocation5 + $0x7f0] ss:$24 sps:$4 sm:$0xff]   ;;  %v3288_v40 = vld [vmem:[#allocation5 + $0x824] ss:$24 sps:$4 sm:$0xff]  }
 0x112   :  { %2166 = vmatprep.subr.bf16.mxu0 %v3204_v41  ;;  %v3286_v41 = vld [vmem:[#allocation5 + $0x820] ss:$24 sps:$4 sm:$0xff]  }
 0x114   :  { %2081 = vmatpush1.bf16.msra.mxu1 %v3199_v42  ;;  %v3291_v42 = vld [vmem:[#allocation5 + $0x854] ss:$24 sps:$4 sm:$0xff]  }
 0x115   :  { %2167 = vmatpush1.bf16.msra.mxu0 %v3202_v43  ;;  %2082 = vmatprep.subr.bf16.mxu1 %v3207_v44  ;;  %v3289_v43 = vld [vmem:[#allocation5 + $0x850] ss:$24 sps:$4 sm:$0xff]   ;;  %v3294_v44 = vld [vmem:[#allocation5 + $0x884] ss:$24 sps:$4 sm:$0xff]  }
 0x116   :  { %2168 = vmatprep.subr.bf16.mxu0 %v3210_v45  ;;  %v3292_v45 = vld [vmem:[#allocation5 + $0x880] ss:$24 sps:$4 sm:$0xff]  }
 0x118   :  { %2083 = vmatpush1.bf16.msra.mxu1 %v3205_v46  ;;  %v3297_v46 = vld [vmem:[#allocation5 + $0x8b4] ss:$24 sps:$4 sm:$0xff]  }
 0x119   :  { %2169 = vmatpush1.bf16.msra.mxu0 %v3208_v47  ;;  %2084 = vmatprep.subr.bf16.mxu1 %v3213_v50  ;;  %v3295_v47 = vld [vmem:[#allocation5 + $0x8b0] ss:$24 sps:$4 sm:$0xff]   ;;  %v3300_v50 = vld [vmem:[#allocation5 + $0x8e4] ss:$24 sps:$4 sm:$0xff]  }
 0x11a   :  { %2170 = vmatprep.subr.bf16.mxu0 %v3216_v51  ;;  %v3298_v51 = vld [vmem:[#allocation5 + $0x8e0] ss:$24 sps:$4 sm:$0xff]  }
 0x11c   :  { %2085 = vmatpush1.bf16.msra.mxu1 %v3211_v52  ;;  %v351_v52 = vlaneseq }
 0x11d   :  { %2171 = vmatpush1.bf16.msra.mxu0 %v3214_v53  ;;  %2086 = vmatprep.subr.bf16.mxu1 %v3219_v54 }
 0x11e   :  { %2172 = vmatprep.subr.bf16.mxu0 %v3222_v55  ;;  %v3526_v53 = vshrl.u32 %v351_v52, 7  ;;  %v3529_v55 = vld [vmem:[#allocation7] sm:$0x3f] }
 0x120   :  { %2087 = vmatpush1.bf16.msra.mxu1 %v3217_v56  ;;  %v353_v54 = vsub.s32 0, %v3526_v53  ;;  %v357_v56 = vsub.s32 1, %v3526_v53 }
 0x121   :  { %2173 = vmatpush1.bf16.msra.mxu0 %v3220_v57  ;;  %2088 = vmatprep.subr.bf16.mxu1 %v3225_v58 }
 0x122   :  { %2174 = vmatprep.subr.bf16.mxu0 %v3228_v59  ;;  %v354_v57 = vrot.slane %v3529_v55, %v353_v54  ;;  %v358_v58 = vrot.slane %v3529_v55, %v357_v56 }
 0x124   :  { %2089 = vmatpush1.bf16.msra.mxu1 %v3223_v60 }
 0x125   :  { %2175 = vmatpush1.bf16.msra.mxu0 %v3226_v61  ;;  %2090 = vmatprep.subr.bf16.mxu1 %v3231_v62 }
 0x126   :  { %2176 = vmatprep.subr.bf16.mxu0 %v3234_v63 }
 0x128   :  { %2091 = vmatpush1.bf16.msra.mxu1 %v3229_v0 }
 0x129   :  { %2177 = vmatpush1.bf16.msra.mxu0 %v3232_v1  ;;  %2092 = vmatprep.subr.bf16.mxu1 %v3237_v2 }
 0x12a   :  { %2178 = vmatprep.subr.bf16.mxu0 %v3240_v3 }
 0x12c   :  { %2093 = vmatpush1.bf16.msra.mxu1 %v3235_v4 }
 0x12d   :  { %2179 = vmatpush1.bf16.msra.mxu0 %v3238_v5  ;;  %2094 = vmatprep.subr.bf16.mxu1 %v3243_v8 }
 0x12e   :  { %2180 = vmatprep.subr.bf16.mxu0 %v3246_v9 }
 0x130   :  { %2095 = vmatpush1.bf16.msra.mxu1 %v3241_v10 }
 0x131   :  { %2181 = vmatpush1.bf16.msra.mxu0 %v3244_v12  ;;  %2096 = vmatprep.subr.bf16.mxu1 %v3249_v13 }
 0x132   :  { %2182 = vmatprep.subr.bf16.mxu0 %v3252_v14 }
 0x134   :  { %2097 = vmatpush1.bf16.msra.mxu1 %v3247_v15 }
 0x135   :  { %2183 = vmatpush1.bf16.msra.mxu0 %v3250_v16 }
 0x136   :  { %2195 = vmatprep.subr.bf16.mxu0 %v3255_v17 }
 0x137   :  { %2099 = vmatmul.mubr.bf16.vlgmr.msra.gmra.mrb[4].mxu1 %v3514_v11 }
 0x138   :  { %2185 = vmatmul.mubr.bf16.vlgmr.msra.gmra.mrb[4].mxu0 %v3334_v20 }
 0x139   :  { %2196 = vmatpush1.bf16.msra.mxu0 %v3253_v18  ;;  %2227 = vmatprep.mubr.bf16.mxu0 %v3511_v34 }
 0x13a   :  { %2197 = vmatprep.subr.bf16.mxu0 %v3258_v19 }
 0x13d   :  { %2198 = vmatpush1.bf16.msra.mxu0 %v3256_v21 }
 0x13e   :  { %2199 = vmatprep.subr.bf16.mxu0 %v3261_v22 }
 0x141   :  { %2200 = vmatpush1.bf16.msra.mxu0 %v3259_v23 }
 0x142   :  { %2201 = vmatprep.subr.bf16.mxu0 %v3264_v24 }
 0x145   :  { %2202 = vmatpush1.bf16.msra.mxu0 %v3262_v25 }
 0x146   :  { %2203 = vmatprep.subr.bf16.mxu0 %v3267_v26  ;;  %v361_v26 = vsub.s32 2, %v3526_v53 }
 0x149   :  { %2204 = vmatpush1.bf16.msra.mxu0 %v3265_v7  ;;  %v365_v7 = vsub.s32 3, %v3526_v53 }
 0x14a   :  { %2205 = vmatprep.subr.bf16.mxu0 %v3270_v6  ;;  %v1885_v49 = vpop.f32.mrb[0].mxu1  ;;  %v362_v6 = vrot.slane %v3529_v55, %v361_v26 }
 0x14b   :  { %v1887_v34 = vpop.f32.mrb[1].mxu1  ;;  %v1886_v59 = vadd.f32 %v1885_v49, %v354_v57 }
 0x14c   :  { %v1889_v29 = vpop.f32.mrb[2].mxu1  ;;  %v1888_v60 = vadd.f32 %v1887_v34, %v358_v58 }
 0x14d   :  { %2206 = vmatpush1.bf16.msra.mxu0 %v3268_v27  ;;  %v1891_v31 = vpop.f32.mrb[3].mxu1  ;;  %v1890_v62 = vadd.f32 %v1889_v29, %v354_v57  ;;  %v366_v27 = vrot.slane %v3529_v55, %v365_v7 }
 0x14e   :  { %2207 = vmatprep.subr.bf16.mxu0 %v3273_v28  ;;  %v1892_v0 = vadd.f32 %v1891_v31, %v358_v58 }
 0x151   :  { %2208 = vmatpush1.bf16.msra.mxu0 %v3271_v48 }
 0x152   :  { %2209 = vmatprep.subr.bf16.mxu0 %v3276_v30 }
 0x155   :  { %2210 = vmatpush1.bf16.msra.mxu0 %v3274_v32 }
 0x156   :  { %2211 = vmatprep.subr.bf16.mxu0 %v3279_v33 }
 0x159   :  { %2212 = vmatpush1.bf16.msra.mxu0 %v3277_v35 }
 0x15a   :  { %2213 = vmatprep.subr.bf16.mxu0 %v3282_v36 }
 0x15d   :  { %2214 = vmatpush1.bf16.msra.mxu0 %v3280_v37 }
 0x15e   :  { %2215 = vmatprep.subr.bf16.mxu0 %v3285_v38 }
 0x161   :  { %2216 = vmatpush1.bf16.msra.mxu0 %v3283_v39 }
 0x162   :  { %2217 = vmatprep.subr.bf16.mxu0 %v3288_v40 }
 0x165   :  { %2218 = vmatpush1.bf16.msra.mxu0 %v3286_v41 }
 0x166   :  { %2219 = vmatprep.subr.bf16.mxu0 %v3291_v42 }
 0x169   :  { %2220 = vmatpush1.bf16.msra.mxu0 %v3289_v43 }
 0x16a   :  { %2221 = vmatprep.subr.bf16.mxu0 %v3294_v44 }
 0x16d   :  { %2222 = vmatpush1.bf16.msra.mxu0 %v3292_v45 }
 0x16e   :  { %2223 = vmatprep.subr.bf16.mxu0 %v3297_v46 }
 0x171   :  { %2224 = vmatpush1.bf16.msra.mxu0 %v3295_v47 }
 0x172   :  { %2225 = vmatprep.subr.bf16.mxu0 %v3300_v50 }
 0x175   :  { %2226 = vmatpush1.bf16.msra.mxu0 %v3298_v51 }
 0x178   :  { %2228 = vmatmul.mubr.bf16.vlgmr.msra.gmra.mrb[4].mxu0 %v3514_v11 }
 0x18b   :  { %v1971_v61 = vpop.f32.mrb[0].mxu0 }
 0x18c   :  { %v2808_v11 = vadd.f32 %v1971_v61, %v1886_v59  ;;  %v1973_v63 = vpop.f32.mrb[1].mxu0  ;;  %v369_v59 = vsub.s32 4, %v3526_v53 }
 0x18d   :  { %v2810_v1 = vadd.f32 %v1973_v63, %v1888_v60  ;;  %v1975_v2 = vpop.f32.mrb[2].mxu0  ;;  %v373_v60 = vsub.s32 5, %v3526_v53 }
 0x18e   :  { %3301 = vtanh.f32 %v2808_v11  ;;  %v2812_v3 = vadd.f32 %v1975_v2, %v1890_v62  ;;  %v1977_v4 = vpop.f32.mrb[3].mxu0  ;;  %v370_v61 = vrot.slane %v3529_v55, %v369_v59 }
 0x18f   :  { %3303 = vtanh.f32 %v2810_v1  ;;  %v2814_v5 = vadd.f32 %v1977_v4, %v1892_v0  ;;  %v374_v62 = vrot.slane %v3529_v55, %v373_v60 }
 0x190   :  { %3305 = vtanh.f32 %v2812_v3 }
 0x191   :  { %3307 = vtanh.f32 %v2814_v5 }
 0x198   :  { %v3302_v8 = vpop.eup %3301 }
 0x199   :  { %v3304_v9 = vpop.eup %3303  ;;  %v2250_v10 = vmul.f32 %v3302_v8, %v3302_v8  ;;  %v2281_v25 = vpack.c.bf16 %v3302_v8, %v3302_v8 }
 0x19a   :  { %v3306_v12 = vpop.eup %3305  ;;  %v2282_v13 = vpack.c.bf16 %v3304_v9, %v3304_v9  ;;  %v2251_v14 = vmul.f32 %v3304_v9, %v3304_v9 }
 0x19b   :  { %v3308_v15 = vpop.eup %3307  ;;  %v2263_v16 = vmul.f32 %v3306_v12, %v3306_v12  ;;  %v2451_v17 = vmul.f32 %v3306_v12, %v3302_v8  ;;  %v2287_v22 = vpack.c.bf16 %v3306_v12, %v3306_v12 }
 0x19c   :  { %2325 = vmatprep.mubr.bf16.mxu1 %v2282_v13  ;;  %v2288_v18 = vpack.c.bf16 %v3308_v15, %v3308_v15  ;;  %v2264_v19 = vmul.f32 %v3308_v15, %v3308_v15  ;;  %v2256_v20 = vadd.f32 %v2251_v14, %v2250_v10  ;;  %v2452_v21 = vmul.f32 %v3308_v15, %v3304_v9 }
 0x19e   :  { %2293 = vmatprep.subr.bf16.mxu1 %v2288_v18  ;;  %v2269_v23 = vadd.f32 %v2264_v19, %v2263_v16  ;;  %v2457_v24 = vadd.f32 %v2452_v21, %v2451_v17 }
 0x19f   :  { %2294 = vmatpush1.bf16.xpose.msra.mxu1 %v2287_v22 }
 0x1a6   :  { %2326 = vmatmul.mubr.bf16.vlgmr.msra.gmra.mrb[8].mxu1 %v2281_v25 }
 0x20a   :  { %v2100_v28 = vpop.f32.mrb[4].mxu1 }
 0x20b   :  { %v2815_v49 = vadd.f32 %v2100_v28, %v362_v6  ;;  %v2102_v34 = vpop.f32.mrb[5].mxu1 }
 0x20c   :  { %v2816_v48 = vadd.f32 %v2102_v34, %v366_v27  ;;  %v2104_v29 = vpop.f32.mrb[6].mxu1 }
 0x20d   :  { %3309 = vtanh.f32 %v2815_v49  ;;  %v2817_v30 = vadd.f32 %v2104_v29, %v362_v6  ;;  %v2106_v31 = vpop.f32.mrb[7].mxu1 }
 0x20e   :  { %3311 = vtanh.f32 %v2816_v48  ;;  %v2818_v32 = vadd.f32 %v2106_v31, %v366_v27 }
 0x20f   :  { %3313 = vtanh.f32 %v2817_v30 }
 0x210   :  { %3315 = vtanh.f32 %v2818_v32 }
 0x217   :  { %v3310_v33 = vpop.eup %3309 }
 0x218   :  { %v3312_v35 = vpop.eup %3311  ;;  %v2252_v36 = vmul.f32 %v3310_v33, %v3310_v33  ;;  %v2283_v58 = vpack.c.bf16 %v3310_v33, %v3310_v33 }
 0x219   :  { %v3314_v37 = vpop.eup %3313  ;;  %v2284_v38 = vpack.c.bf16 %v3312_v35, %v3312_v35  ;;  %v2253_v39 = vmul.f32 %v3312_v35, %v3312_v35 }
 0x21a   :  { %v3316_v40 = vpop.eup %3315  ;;  %v2265_v41 = vmul.f32 %v3314_v37, %v3314_v37  ;;  %v2257_v42 = vadd.f32 %v2256_v20, %v2252_v36  ;;  %v2453_v43 = vmul.f32 %v3314_v37, %v3310_v33  ;;  %v2289_v47 = vpack.c.bf16 %v3314_v37, %v3314_v37 }
 0x21b   :  { %2365 = vmatprep.mubr.bf16.mxu1 %v2284_v38  ;;  %v2290_v44 = vpack.c.bf16 %v3316_v40, %v3316_v40  ;;  %v2266_v45 = vmul.f32 %v3316_v40, %v3316_v40  ;;  %v2454_v46 = vmul.f32 %v3316_v40, %v3312_v35 }
 0x21c   :  { %v2270_v50 = vadd.f32 %v2269_v23, %v2265_v41  ;;  %v2258_v51 = vadd.f32 %v2257_v42, %v2253_v39  ;;  %v2458_v52 = vadd.f32 %v2457_v24, %v2453_v43 }
 0x21d   :  { %2333 = vmatprep.subr.bf16.mxu1 %v2290_v44 }
 0x21e   :  { %2334 = vmatpush1.bf16.xpose.msra.mxu1 %v2289_v47  ;;  %v2271_v56 = vadd.f32 %v2270_v50, %v2266_v45  ;;  %v2459_v57 = vadd.f32 %v2458_v52, %v2454_v46 }
 0x225   :  { %2366 = vmatmul.mubr.bf16.vlgmr.msra.gmra.mrb[8].mxu1 %v2283_v58 }
 0x24b   :  { %v2229_v11 = vpop.f32.mrb[4].mxu0 }
 0x24c   :  { %v2819_v63 = vadd.f32 %v2229_v11, %v370_v61  ;;  %v2231_v0 = vpop.f32.mrb[5].mxu0 }
 0x24d   :  { %v2820_v1 = vadd.f32 %v2231_v0, %v374_v62  ;;  %v2233_v2 = vpop.f32.mrb[6].mxu0 }
 0x24e   :  { %3317 = vtanh.f32 %v2819_v63  ;;  %v2821_v3 = vadd.f32 %v2233_v2, %v370_v61  ;;  %v2235_v4 = vpop.f32.mrb[7].mxu0 }
 0x24f   :  { %3319 = vtanh.f32 %v2820_v1  ;;  %v2822_v5 = vadd.f32 %v2235_v4, %v374_v62 }
 0x250   :  { %3321 = vtanh.f32 %v2821_v3 }
 0x251   :  { %3323 = vtanh.f32 %v2822_v5 }
 0x258   :  { %v3318_v8 = vpop.eup %3317 }
 0x259   :  { %v3320_v9 = vpop.eup %3319  ;;  %v2254_v10 = vmul.f32 %v3318_v8, %v3318_v8  ;;  %v2285_v7 = vpack.c.bf16 %v3318_v8, %v3318_v8 }
 0x25a   :  { %v3322_v12 = vpop.eup %3321  ;;  %v2286_v13 = vpack.c.bf16 %v3320_v9, %v3320_v9  ;;  %v2255_v14 = vmul.f32 %v3320_v9, %v3320_v9 }
 0x25b   :  { %v3324_v15 = vpop.eup %3323  ;;  %v2267_v55 = vmul.f32 %v3322_v12, %v3322_v12  ;;  %v2259_v16 = vadd.f32 %v2258_v51, %v2254_v10  ;;  %v2455_v17 = vmul.f32 %v3322_v12, %v3318_v8  ;;  %v2291_v21 = vpack.c.bf16 %v3322_v12, %v3322_v12 }
 0x25c   :  { %2405 = vmatprep.mubr.bf16.mxu1 %v2286_v13  ;;  %v2292_v18 = vpack.c.bf16 %v3324_v15, %v3324_v15  ;;  %v2268_v19 = vmul.f32 %v3324_v15, %v3324_v15  ;;  %v2456_v20 = vmul.f32 %v3324_v15, %v3320_v9 }
 0x25d   :  { %v2272_v22 = vadd.f32 %v2271_v56, %v2267_v55  ;;  %v2260_v23 = vadd.f32 %v2259_v16, %v2255_v14  ;;  %v2460_v24 = vadd.f32 %v2459_v57, %v2455_v17 }
 0x25e   :  { %2373 = vmatprep.subr.bf16.mxu1 %v2292_v18 }
 0x25f   :  { %2374 = vmatpush1.bf16.xpose.msra.mxu1 %v2291_v21  ;;  %v2273_v25 = vadd.f32 %v2272_v22, %v2268_v19  ;;  %v2461_v26 = vadd.f32 %v2460_v24, %v2456_v20 }
 0x261   :  { %2274 = vadd.xlane.f32.xlu0 %v2273_v25 }
 0x265   :  { %2261 = vadd.xlane.f32.xlu0 %v2260_v23 }
 0x266   :  { %2406 = vmatmul.mubr.bf16.vlgmr.msra.gmra.mrb[8].mxu1 %v2285_v7 }
 0x2ee   :  { %v2275_v6 = vpop.xlane.xlu0 %2274 }
 0x2ef   :  { %v2279_v27 = vmax.f32 %v2275_v6, 1e-16 }
 0x2f1   :  { %3325 = vrsqrt.f32 %v2279_v27 }
 0x2f2   :  { %v2262_v30 = vpop.xlane.xlu0 %2261 }
 0x2f3   :  { %v2276_v31 = vmax.f32 %v2262_v30, 1e-16 }
 0x2f5   :  { %3327 = vrsqrt.f32 %v2276_v31 }
 0x2fb   :  { %v3326_v28 = vpop.eup %3325 }
 0x2fc   :  { %2414 = vxpose.xlu1.b32.start.end [1/1] (short) (narrow) %v3326_v28, 8 }
 0x2ff   :  { %v3328_v32 = vpop.eup %3327 }
 0x300   :  { %v2278_v33 = vmul.f32 20.0, %v3328_v32 }
 0x339   :  { %v2407_v49 = vpop.f32.mrb[8].mxu1 }
 0x33a   :  { %v2409_v34 = vpop.f32.mrb[9].mxu1  ;;  %v2413_v36 = vmul.f32 %v2407_v49, %v2278_v33 }
 0x33b   :  { %v2410_v48 = vpop.f32.mrb[10].mxu1 }
 0x33c   :  { %v2411_v29 = vpop.f32.mrb[11].mxu1 }
 0x37c   :  { %v2430_v35 = vpop.trf.xlu1 }
 0x37d   :  { %v2449_v37 = vrot.slane %v2430_v35, %v353_v54 }
 0x37f   :  { %v2450_v38 = vmul.f32 %v2449_v37, %v2413_v36 }
 0x381   :  { %v2467_v39 = vsel %vm2466_vm0, %v2450_v38, -inf }
 0x382   :  { %2468 = vmax.xlane.f32.xlu1 %v2467_v39 }
 0x40f   :  { %v2469_v40 = vpop.xlane.xlu1 %2468 }
 0x410   :  { %v2470_v41 = vsub.f32 %v2450_v38, %v2469_v40 }
 0x412   :  { %v2471_v42 = vmul.f32 1.442695, %v2470_v41 }
 0x414   :  { %3329 = vpow2.f32 %v2471_v42 }
 0x41e   :  { %v3330_v43 = vpop.eup %3329 }
 0x41f   :  { %v2473_v44 = vsel %vm2466_vm0, %v3330_v43, 0.0 }
 0x420   :  { %2474 = vadd.xlane.f32.xlu0 %v2473_v44 }
 0x424   :  { %2462 = vadd.xlane.f32.xlu0 %v2461_v26 }
 0x4ad   :  { %v2475_v45 = vpop.xlane.xlu0 %2474 }
 0x4ae   :  { %3331 = vlog2.f32 %v2475_v45 }
 0x4b1   :  { %v2463_v46 = vpop.xlane.xlu0 %2462 }
 0x4b2   :  { %v2464_v47 = vmul.f32 %v2463_v46, %v2278_v33 }
 0x4b4   :  { %v2465_v53 = vmul.f32 %v3326_v28, %v2464_v47 }
 0x4b8   :  { %v3332_v50 = vpop.eup %3331 }
 0x4b9   :  { %v2477_v51 = vmul.f32 0.6931472, %v3332_v50 }
 0x4bb   :  { %v2478_v54 = vadd.f32 %v2477_v51, %v2469_v40 }
 0x4bd   :  { %v2479_v52 = vsub.f32 %v2478_v54, %v2465_v53 }
 0x4bf   :  { %v2481_v56 = vsel %vm2480_vm1, %v2479_v52, 0.0 }
 0x4c0   :  { %2482 = vadd.xlane.f32.xlu0 %v2481_v56 }
 0x54d   :  { %v2483_v57 = vpop.xlane.xlu0 %2482 }
 0x54e   :  { %v2484_v58 = vrot.slane %v2483_v57, 4 }
 0x550   :  { %v2485_v59 = vadd.f32 %v2484_v58, %v2483_v57 }
 0x552   :  { %v2486_v60 = vrot.slane %v2485_v59, 2 }
 0x554   :  { %v2487_v61 = vadd.f32 %v2486_v60, %v2485_v59 }
 0x556   :  { %v2488_v62 = vrot.slane %v2487_v61, 1 }
 0x558   :  { %v2489_v11 = vadd.f32 %v2488_v62, %v2487_v61 }
 0x55a   :  { %2851 = vpush %v2489_v11 }
 0x58b   :  { %s2852_s22 = spop %2851 }
 0x58c   :  { %s2493_s23 = smul.f32 0.125, %s2852_s22 }
 0x58e   :  { %v2494_v63 = vstv %s2493_s23 }
 0x58f   :  { %2496 = vst.msk [vmem:[#allocation8] sm:$0x1] %vm2495_vm2, %v2494_v63 }
 0x590   :  { %3412 = shalt.err (!%p3409_p0)
}
 0x591   :  { %s3413_s28 = scalar_lea.hbm %s3561_s3, 16 }
 0x592   :  { %p3414_p1 = scmp.ne.s32.totalorder %s3561_s3, %s3413_s28  ;;  %p3417_p2 = scmp.lt.u32.totalorder %s3413_s28, %s3561_s3 }
 0x594   :  { %p3419_p3 = pnand %p3417_p2, %p3414_p1 }
 0x596   :  { %3422 = shalt.err (!%p3419_p3)
}
 0x597   :  { %2506 = dma.vmem_to_hbm [thread:$0]  %s2504_s21, 16, %s3561_s3, [#allocation4]  }
 0x598   :  { %3427 = dma.done.wait [#allocation4], 16  }
 0x599   :  { %3428 = vsyncadd [#allocation4], 4294967280 }
 0x59a   :  { %2510 = vsyncpa [#allocation3], 1 }
 0x59b   :  { %2511 = vsyncpa [#allocation6], 1 }
 0x59c   :  { %2512 = vsyncpa [#allocation4], 1 }

</bundles_post_ra>
